<compile_context>
chip_gen: v7x
topology: tpu7x:2x2x1
jax: 0.10.0
libtpu: 0.0.40
codegen_flags: <defaults>
</compile_context>

<pallas_src>
import functools

import jax
import jax.numpy as jnp
import numpy as np
from jax.experimental import pallas as pl
from jax.experimental.pallas import tpu as pltpu


def _hnn_kernel(x_ref, w1t_ref, b1_ref, weff_ref, o_ref, *,
                d, use_bf16_tanh, small_d):
    # x_ref:    (TB, 2n)   batch tile
    # w1t_ref:  (2n, hid)  W1^T            (grid-resident)
    # b1_ref:   (1, hid)   bias            (grid-resident)
    # weff_ref: (hid, 2n)  folded weight   (grid-resident)
    # o_ref:    (TB, 2n)
    if small_d:
        # K = 2n is tiny: two broadcast-FMAs on the VPU beat a K=2 MXU matmul.
        x = x_ref[...]
        z = b1_ref[...]                                   # (1, hid) -> bcast
        for j in range(d):                                # static unroll
            z = z + x[:, j:j + 1] * w1t_ref[j:j + 1, :]   # (TB, hid)
    else:
        z = jnp.dot(x_ref[...], w1t_ref[...],
                    preferred_element_type=jnp.float32) + b1_ref[...]

    if use_bf16_tanh:
        # v6e/v7x: bf16 EUP roughly doubles tanh throughput (binding unit).
        t = jnp.tanh(z.astype(jnp.bfloat16)).astype(jnp.float32)
    else:
        t = jnp.tanh(z)

    s = 1.0 - t * t                                       # f32, (TB, hid)
    # out = (1 - tanh(z)^2) @ W_eff   (w2 + symplectic permutation pre-folded)
    out = jnp.dot(s, weff_ref[...], preferred_element_type=jnp.float32)
    o_ref[...] = out.astype(o_ref.dtype)


def _device_kind():
    try:
        return jax.devices()[0].device_kind.lower()
    except Exception:
        return ""


def _auto_bf16_tanh(kind):
    # v6e / v7x EUPs support bf16 transcendentals; v5e and older do not.
    return ("v6" in kind) or ("v7" in kind)


def _auto_tile(kind):
    if "v7" in kind:
        return 4096            # 64 MiB VMEM: keep tiles smaller
    if ("v5" in kind) or ("v6" in kind):
        return 8192            # 128 MiB VMEM: amortize per-step overhead
    return 2048                # conservative default


def _auto_vmem_limit(kind):
    if "v7" in kind:
        return 40 * 1024 * 1024
    if ("v5" in kind) or ("v6" in kind):
        return 64 * 1024 * 1024
    return None


def hnn_forward(x, w1, b1, w2, *, n, tb=None, use_bf16_tanh=None):
    """HNN forward.  x: (B, 2n); w1: (hid, 2n); b1, w2: (1, hid)."""
    B, D = x.shape
    hid = w1.shape[0]
    assert D == 2 * n and w1.shape == (hid, D)
    assert b1.shape == (1, hid) and w2.shape == (1, hid)

    kind = _device_kind()
    if use_bf16_tanh is None:
        use_bf16_tanh = _auto_bf16_tanh(kind)
    if tb is None:
        tb = _auto_tile(kind)

    # One-time wrapper-side weight folding:
    #   gradH = ((1 - t^2) * w2) @ W1 = (1 - t^2) @ (w2^T * W1)
    #   out   = gradH with symplectic column permutation / negation
    w1t = jnp.transpose(w1)                                   # (2n, hid)
    w_g = jnp.reshape(w2, (hid, 1)) * w1                      # (hid, 2n)
    w_eff = jnp.concatenate([w_g[:, n:], -w_g[:, :n]], axis=1)  # (hid, 2n)

    # Batch tiling: tile is a multiple of 8 sublanes; pad B to a tile multiple.
    tb = 8 * pl.cdiv(tb, 8)
    b_pad8 = 8 * pl.cdiv(B, 8)
    tb = min(tb, b_pad8)
    b_pad = tb * pl.cdiv(b_pad8, tb)
    xp = jnp.pad(x, ((0, b_pad - B), (0, 0))) if b_pad != B else x

    kernel = functools.partial(_hnn_kernel, d=D,
                               use_bf16_tanh=use_bf16_tanh,
                               small_d=(D < 16))

    out = pl.pallas_call(
        kernel,
        out_shape=jax.ShapeDtypeStruct((b_pad, D), x.dtype),
        grid=(b_pad // tb,),
        in_specs=[
            pl.BlockSpec((tb, D), lambda i: (i, 0)),      # x batch tile
            pl.BlockSpec((D, hid), lambda i: (0, 0)),     # W1^T (resident)
            pl.BlockSpec((1, hid), lambda i: (0, 0)),     # b1   (resident)
            pl.BlockSpec((hid, D), lambda i: (0, 0)),     # W_eff (resident)
        ],
        out_specs=pl.BlockSpec((tb, D), lambda i: (i, 0)),
        compiler_params=pltpu.CompilerParams(
            dimension_semantics=("parallel",),
            vmem_limit_bytes=_auto_vmem_limit(kind)),
    )(xp, w1t, b1, w_eff)

    return out[:B] if b_pad != B else out


def _reference(x, w1, b1, w2, *, n):
    """Pure-JAX reference via autodiff (mirrors torch.autograd.grad)."""
    def H_sum(xx):
        z = xx @ w1.T + b1[0]
        h = jnp.tanh(z)
        return jnp.sum(h @ w2[0])          # b2 omitted; does not affect grad
    grad_h = jax.grad(H_sum)(x)
    return jnp.concatenate([grad_h[:, n:], -grad_h[:, :n]], axis=1)


if __name__ == "__main__":
    n = 1                    # module default dim=1 -> 2*n = 2 features
    B = 2048                 # enough rows to exercise the batch grid
    hid = 64

    key = jax.random.PRNGKey(0)
    kx, k1, k2, k3 = jax.random.split(key, 4)
    x = jax.random.normal(kx, (B, 2 * n), dtype=jnp.float32)
    # Deterministic synthetic "Linear" parameters (not a checkpoint load).
    w1 = jax.random.normal(k1, (hid, 2 * n), dtype=jnp.float32) * 0.3
    b1 = jax.random.normal(k2, (1, hid), dtype=jnp.float32) * 0.1
    w2 = jax.random.normal(k3, (1, hid), dtype=jnp.float32) * 0.3

    ref = _reference(x, w1, b1, w2, n=n)

    # 1) Strict check: f32 tanh path, 4-way batch grid (tb=512).
    out_f32 = hnn_forward(x, w1, b1, w2, n=n, tb=512, use_bf16_tanh=False)
    out_f32 = jax.block_until_ready(out_f32)
    np.testing.assert_allclose(np.asarray(out_f32), np.asarray(ref),
                               rtol=1e-5, atol=1e-5)

    # 2) Auto path: generation-appropriate tile + bf16 tanh on v6e/v7x.
    kind = _device_kind()
    use_bf16 = _auto_bf16_tanh(kind)
    out_auto = hnn_forward(x, w1, b1, w2, n=n)
    out_auto = jax.block_until_ready(out_auto)
    tol = 3e-2 if use_bf16 else 1e-5
    np.testing.assert_allclose(np.asarray(out_auto), np.asarray(ref),
                               rtol=tol, atol=tol)

    print("KERNEL_OK")
</pallas_src>

<mosaic_0001>
module attributes {stable_mosaic.version = 11 : i64} {
  func.func @_hnn_kernel(%arg0: i32, %arg1: memref<512x2xf32, #tpu.memory_space<vmem>>, %arg2: memref<2x64xf32, #tpu.memory_space<vmem>>, %arg3: memref<1x64xf32, #tpu.memory_space<vmem>>, %arg4: memref<64x2xf32, #tpu.memory_space<vmem>>, %arg5: memref<512x2xf32, #tpu.memory_space<vmem>>) attributes {dimension_semantics = [#tpu.dimension_semantics<parallel>], iteration_bounds = array<i64: 4>, scalar_prefetch = 0 : i64, scratch_operands = 0 : i64, tpu.core_type = #tpu.core_type<tc>, window_params = [{transform_indices = @transform_0, window_bounds = array<i64: 512, 2>}, {pipeline_mode = #tpu.pipeline_mode<synchronous>, transform_indices = @transform_1, window_bounds = array<i64: 2, 64>}, {pipeline_mode = #tpu.pipeline_mode<synchronous>, transform_indices = @transform_2, window_bounds = array<i64: 1, 64>}, {pipeline_mode = #tpu.pipeline_mode<synchronous>, transform_indices = @transform_3, window_bounds = array<i64: 64, 2>}, {transform_indices = @transform_4, window_bounds = array<i64: 512, 2>}]} {
    %c0 = arith.constant 0 : index
    %c0_0 = arith.constant 0 : index
    %0 = vector.load %arg1[%c0, %c0_0] : memref<512x2xf32, #tpu.memory_space<vmem>>, vector<512x2xf32>
    %c0_1 = arith.constant 0 : index
    %c0_2 = arith.constant 0 : index
    %1 = vector.load %arg3[%c0_1, %c0_2] : memref<1x64xf32, #tpu.memory_space<vmem>>, vector<1x64xf32>
    %2 = vector.extract_strided_slice %0 {offsets = [0, 0], sizes = [512, 1], strides = [1, 1]} : vector<512x2xf32> to vector<512x1xf32>
    %c0_3 = arith.constant 0 : index
    %c0_4 = arith.constant 0 : index
    %3 = vector.load %arg2[%c0_3, %c0_4] : memref<2x64xf32, #tpu.memory_space<vmem>>, vector<1x64xf32>
    %4 = vector.broadcast %2 : vector<512x1xf32> to vector<512x64xf32>
    %5 = vector.broadcast %3 : vector<1x64xf32> to vector<512x64xf32>
    %6 = arith.mulf %4, %5 : vector<512x64xf32>
    %7 = vector.broadcast %1 : vector<1x64xf32> to vector<512x64xf32>
    %8 = arith.addf %7, %6 : vector<512x64xf32>
    %9 = vector.extract_strided_slice %0 {offsets = [0, 1], sizes = [512, 1], strides = [1, 1]} : vector<512x2xf32> to vector<512x1xf32>
    %c1 = arith.constant 1 : index
    %c0_5 = arith.constant 0 : index
    %10 = vector.load %arg2[%c1, %c0_5] : memref<2x64xf32, #tpu.memory_space<vmem>>, vector<1x64xf32>
    %11 = vector.broadcast %9 : vector<512x1xf32> to vector<512x64xf32>
    %12 = vector.broadcast %10 : vector<1x64xf32> to vector<512x64xf32>
    %13 = arith.mulf %11, %12 : vector<512x64xf32>
    %14 = arith.addf %8, %13 : vector<512x64xf32>
    %15 = math.tanh %14 : vector<512x64xf32>
    %16 = arith.mulf %15, %15 : vector<512x64xf32>
    %cst = arith.constant 1.000000e+00 : f32
    %17 = vector.broadcast %cst : f32 to vector<512x64xf32>
    %18 = arith.subf %17, %16 : vector<512x64xf32>
    %c0_6 = arith.constant 0 : index
    %c0_7 = arith.constant 0 : index
    %19 = vector.load %arg4[%c0_6, %c0_7] : memref<64x2xf32, #tpu.memory_space<vmem>>, vector<64x2xf32>
    %cst_8 = arith.constant dense<0.000000e+00> : vector<512x2xf32>
    %20 = tpu.matmul %18, %19, %cst_8 {dimension_numbers = #tpu.dot_dimension_numbers<[1], [0], [0], [1], [0, 0, 1, 1], [], []>} : vector<512x64xf32>, vector<64x2xf32>, vector<512x2xf32> -> vector<512x2xf32>
    %c0_9 = arith.constant 0 : index
    %c0_10 = arith.constant 0 : index
    %21 = vector.load %arg5[%c0_9, %c0_10] : memref<512x2xf32, #tpu.memory_space<vmem>>, vector<512x2xf32>
    tpu.vector_store %arg5[%c0_9, %c0_10], %20 {strides = array<i32>} : memref<512x2xf32, #tpu.memory_space<vmem>>, vector<512x2xf32>,
    return
  }
  func.func @transform_0(%arg0: i32) -> (i32, i32) {
    %c0_i32 = arith.constant 0 : i32
    %c0_i32_0 = arith.constant 0 : i32
    return %arg0, %c0_i32 : i32, i32
  }
  func.func @transform_1(%arg0: i32) -> (i32, i32) {
    %c0_i32 = arith.constant 0 : i32
    %c0_i32_0 = arith.constant 0 : i32
    %c0_i32_1 = arith.constant 0 : i32
    return %c0_i32, %c0_i32_0 : i32, i32
  }
  func.func @transform_2(%arg0: i32) -> (i32, i32) {
    %c0_i32 = arith.constant 0 : i32
    %c0_i32_0 = arith.constant 0 : i32
    %c0_i32_1 = arith.constant 0 : i32
    return %c0_i32, %c0_i32_0 : i32, i32
  }
  func.func @transform_3(%arg0: i32) -> (i32, i32) {
    %c0_i32 = arith.constant 0 : i32
    %c0_i32_0 = arith.constant 0 : i32
    %c0_i32_1 = arith.constant 0 : i32
    return %c0_i32, %c0_i32_0 : i32, i32
  }
  func.func @transform_4(%arg0: i32) -> (i32, i32) {
    %c0_i32 = arith.constant 0 : i32
    %c0_i32_0 = arith.constant 0 : i32
    return %arg0, %c0_i32 : i32, i32
  }
}

</mosaic_0001>

<bundles_post_ra>
// kernel: tpu_custom_call.1
= control target key start
LH: loop header
LB: loop body
LE: loop exit
PB: predicated region body
PF: predicated region fallthrough
CT: control target
= control target key end

     0   :  { %s2504_s15 = smov 0   ;;  %s3405_s0 = inlined_call_operand.vmem [shape: f32[2048,2], index: 0, kind: input, shape index: {}]   ;;  %s3406_s1 = inlined_call_operand.vmem [shape: f32[2,64], index: 1, kind: input, shape index: {}]   ;;  %s3407_s2 = inlined_call_operand.vmem [shape: f32[1,64], index: 2, kind: input, shape index: {}]   ;;  %s3408_s3 = inlined_call_operand.vmem [shape: f32[64,2], index: 3, kind: input, shape index: {}]   ;;  %s3409_s4 = inlined_call_operand.vmem [shape: f32[2048,2], index: 4, kind: output, shape index: {}]  }
   0x1 LB: > { %s2013_s16 = sadd.s32 4294967295, %s2475_s15   ;;  %p2017_p0 = scmp.ge.s32.totalorder %s2475_s15, 1  ;;  %s2475_s15 = sphi %s2504_s15, %s14_s15  }
   0x2   : > { %p163_p1 = scmp.lt.s32.totalorder %s2475_s15, 5 }
   0x4   : > { %p164_p2 = pnand %p2017_p0, %p163_p1 }
   0x6   : > { %167 = sbr.rel (%p164_p2) target bundleno = 710 (0x2c6), region = 36 }
   0xd   : > { %s2018_s17 = sshll.u32 %s2013_s16, 6  ;;  %v3412_v0 = vmov 0   ;;  %v3410_v40 = vmov 1   ;;  %v1306_v43 = vld [vmem:[%s3408_s3] sm:$0xff]  ;;  %v1307_v44 = vld [vmem:[%s3408_s3 + $0x8] sm:$0xff]  ;;  %v1308_v47 = vld [vmem:[%s3408_s3 + $0x10] sm:$0xff] }
   0xe   : > { %2310 = vset.pattern.permute.xlu1 %v3412_v0  ;;  %2309 = vset.pattern.permute.xlu0 %v3412_v0  ;;  %p190_p3 = scmp.lt.s32.totalorder %s2018_s17, 255  ;;  %v2275_v45 = vpack.c.bf16 %v1307_v44, %v1306_v43  ;;  %v1309_v48 = vld [vmem:[%s3408_s3 + $0x18] sm:$0xff]  ;;  %v1310_v51 = vld [vmem:[%s3408_s3 + $0x20] sm:$0xff]  ;;  %v1311_v52 = vld [vmem:[%s3408_s3 + $0x28] sm:$0xff]  ;;  %vm1314_vm0 = vcmask 523264   ;;  %vm1892_vm1 = vcmask 15360  }
   0xf   : > { %v2279_v49 = vpack.c.bf16 %v1309_v48, %v1308_v47  ;;  %v2283_v53 = vpack.c.bf16 %v1311_v52, %v1310_v51  ;;  %v1312_v55 = vld [vmem:[%s3408_s3 + $0x30] sm:$0xff]  ;;  %v1313_v56 = vld [vmem:[%s3408_s3 + $0x38] sm:$0xff] }
  0x10   : > { %s3455_s17 = smov (!%p190_p3, %s2018_s17), 255  ;;  %2276 = vmatprep.subr.bf16.mxu0 %v2275_v45  ;;  %2291 = vmatprep.subr.bf16.mxu1 %v2275_v45  ;;  %v2287_v57 = vpack.c.bf16 %v1313_v56, %v1312_v55 }
  0x11   : > { %s2019_s18 = sshll.u32 %s3455_s17, 3  ;;  %2278 = vmatpush3.bf16.msra.mxu0 %v2275_v45  ;;  %2295 = vmatpush3.bf16.msra.mxu1 %v2275_v45 }
  0x12   : > { %s2522_s21 = scalar_lea.vmem %s3405_s0, %s2019_s18  ;;  %2280 = vmatprep.subr.bf16.mxu0 %v2279_v49  ;;  %2292 = vmatprep.subr.bf16.mxu1 %v2279_v49  ;;  %s3246_s29 = scalar_lea.vmem %s3409_s4, %s2019_s18 }
  0x13   : > { %v2525_v1 = vld [vmem:[%s2522_s21 + $0x10] sm:$0xff]  ;;  %v2528_v2 = vld [vmem:[%s2522_s21] sm:$0xff]  ;;  %v2533_v3 = vld [vmem:[%s2522_s21 + $0x18] sm:$0xff] }
  0x14   : > { %279 = vperm.xlu1 %2310, %v2525_v1   ;;  %269 = vperm.xlu0 %2309, %v2528_v2   ;;  %v2536_v4 = vld [vmem:[%s2522_s21 + $0x8] sm:$0xff]  ;;  %v2544_v6 = vld [vmem:[%s2522_s21 + $0x20] sm:$0xff]  ;;  %v2549_v7 = vld [vmem:[%s2522_s21 + $0x38] sm:$0xff] }
  0x15   : > { %v2541_v5 = vld [vmem:[%s2522_s21 + $0x28] sm:$0xff]  ;;  %v2552_v8 = vld [vmem:[%s2522_s21 + $0x30] sm:$0xff]  ;;  %v2560_v10 = vld [vmem:[%s2522_s21 + $0x40] sm:$0xff]  ;;  %2282 = vmatpush3.bf16.msra.mxu0 %v2279_v49  ;;  %2296 = vmatpush3.bf16.msra.mxu1 %v2279_v49 }
  0x16   : > { %v2557_v9 = vld [vmem:[%s2522_s21 + $0x48] sm:$0xff]  ;;  %v2565_v11 = vld [vmem:[%s2522_s21 + $0x58] sm:$0xff]  ;;  %v2568_v12 = vld [vmem:[%s2522_s21 + $0x50] sm:$0xff]  ;;  %2284 = vmatprep.subr.bf16.mxu0 %v2283_v53  ;;  %2293 = vmatprep.subr.bf16.mxu1 %v2283_v53 }
  0x17   : > { %v2573_v13 = vld [vmem:[%s2522_s21 + $0x68] sm:$0xff]  ;;  %v2576_v14 = vld [vmem:[%s2522_s21 + $0x60] sm:$0xff]  ;;  %v2581_v15 = vld [vmem:[%s2522_s21 + $0x78] sm:$0xff] }
  0x18   : > { %284 = vperm.xlu1 %2310, %v2533_v3   ;;  %274 = vperm.xlu0 %2309, %v2536_v4   ;;  %v2584_v16 = vld [vmem:[%s2522_s21 + $0x70] sm:$0xff]  ;;  %v2589_v17 = vld [vmem:[%s2522_s21 + $0x88] sm:$0xff]  ;;  %v2592_v18 = vld [vmem:[%s2522_s21 + $0x80] sm:$0xff] }
  0x19   : > { %v2597_v19 = vld [vmem:[%s2522_s21 + $0x98] sm:$0xff]  ;;  %v2600_v20 = vld [vmem:[%s2522_s21 + $0x90] sm:$0xff]  ;;  %v2605_v21 = vld [vmem:[%s2522_s21 + $0xa8] sm:$0xff]  ;;  %2286 = vmatpush3.bf16.msra.mxu0 %v2283_v53  ;;  %2297 = vmatpush3.bf16.msra.mxu1 %v2283_v53 }
  0x1a   : > { %v2608_v22 = vld [vmem:[%s2522_s21 + $0xa0] sm:$0xff]  ;;  %v2613_v23 = vld [vmem:[%s2522_s21 + $0xb8] sm:$0xff]  ;;  %v2616_v24 = vld [vmem:[%s2522_s21 + $0xb0] sm:$0xff]  ;;  %2288 = vmatprep.subr.bf16.mxu0 %v2287_v57  ;;  %2294 = vmatprep.subr.bf16.mxu1 %v2287_v57 }
  0x1b   : > { %v2621_v25 = vld [vmem:[%s2522_s21 + $0xc8] sm:$0xff]  ;;  %v2624_v26 = vld [vmem:[%s2522_s21 + $0xc0] sm:$0xff]  ;;  %v2629_v27 = vld [vmem:[%s2522_s21 + $0xd8] sm:$0xff] }
  0x1c   : > { %294 = vperm.xlu1 %2310, %v2541_v5   ;;  %289 = vperm.xlu0 %2309, %v2544_v6   ;;  %v2632_v28 = vld [vmem:[%s2522_s21 + $0xd0] sm:$0xff]  ;;  %v2637_v29 = vld [vmem:[%s2522_s21 + $0xe8] sm:$0xff]  ;;  %v2640_v30 = vld [vmem:[%s2522_s21 + $0xe0] sm:$0xff] }
  0x1d   : > { %v2645_v31 = vld [vmem:[%s2522_s21 + $0xf8] sm:$0xff]  ;;  %v231_v32 = vld [vmem:[%s2522_s21 + $0xf0] sm:$0xff]  ;;  %v234_v33 = vld [vmem:[%s2522_s21 + $0x108] sm:$0xff]  ;;  %2290 = vmatpush3.bf16.msra.mxu0 %v2287_v57  ;;  %2298 = vmatpush3.bf16.msra.mxu1 %v2287_v57 }
  0x1e   : > { %v2651_v34 = vld [vmem:[%s2522_s21 + $0x100] sm:$0xff]  ;;  %v236_v35 = vld [vmem:[%s2522_s21 + $0x118] sm:$0xff]  ;;  %v235_v36 = vld [vmem:[%s2522_s21 + $0x110] sm:$0xff] }
  0x1f   : > { %v238_v37 = vld [vmem:[%s2522_s21 + $0x128] sm:$0xff]  ;;  %v237_v38 = vld [vmem:[%s2522_s21 + $0x120] sm:$0xff]  ;;  %v239_v39 = vld [vmem:[%s2522_s21 + $0x130] sm:$0xff] }
  0x20   : > { %304 = vperm.xlu1 %2310, %v2549_v7   ;;  %299 = vperm.xlu0 %2309, %v2552_v8   ;;  %v240_v41 = vld [vmem:[%s2522_s21 + $0x138] sm:$0xff]  ;;  %v2664_v42 = vld [vmem:[%s2522_s21 + $0x148] sm:$0xff]  ;;  %v241_v63 = vld [vmem:[%s2522_s21 + $0x140] sm:$0xff] }
  0x21   : > { %v2674_v46 = vld [vmem:[%s2522_s21 + $0x158] sm:$0xff]  ;;  %v2684_v50 = vld [vmem:[%s2522_s21 + $0x168] sm:$0xff] }
  0x22   : > { %v2694_v54 = vld [vmem:[%s2522_s21 + $0x178] sm:$0xff]  ;;  %v2704_v58 = vld [vmem:[%s2522_s21 + $0x188] sm:$0xff] }
  0x23   : > { %v2708_v59 = vld [vmem:[%s2522_s21 + $0x198] sm:$0xff]  ;;  %v2713_v60 = vld [vmem:[%s2522_s21 + $0x1a8] sm:$0xff] }
  0x24   : > { %314 = vperm.xlu1 %2310, %v2557_v9   ;;  %309 = vperm.xlu0 %2309, %v2560_v10   ;;  %v2717_v61 = vld [vmem:[%s2522_s21 + $0x1b8] sm:$0xff]  ;;  %v2721_v62 = vld [vmem:[%s2522_s21 + $0x1c8] sm:$0xff] }
  0x28   : > { %324 = vperm.xlu1 %2310, %v2565_v11   ;;  %319 = vperm.xlu0 %2309, %v2568_v12  }
  0x2c   : > { %334 = vperm.xlu1 %2310, %v2573_v13   ;;  %329 = vperm.xlu0 %2309, %v2576_v14  }
  0x30   : > { %344 = vperm.xlu1 %2310, %v2581_v15   ;;  %339 = vperm.xlu0 %2309, %v2584_v16  }
  0x34   : > { %354 = vperm.xlu1 %2310, %v2589_v17   ;;  %349 = vperm.xlu0 %2309, %v2592_v18  }
  0x38   : > { %364 = vperm.xlu1 %2310, %v2597_v19   ;;  %359 = vperm.xlu0 %2309, %v2600_v20  }
  0x3c   : > { %374 = vperm.xlu1 %2310, %v2605_v21   ;;  %369 = vperm.xlu0 %2309, %v2608_v22  }
  0x40   : > { %384 = vperm.xlu1 %2310, %v2613_v23   ;;  %379 = vperm.xlu0 %2309, %v2616_v24  }
  0x44   : > { %394 = vperm.xlu1 %2310, %v2621_v25   ;;  %389 = vperm.xlu0 %2309, %v2624_v26  }
  0x48   : > { %404 = vperm.xlu1 %2310, %v2629_v27   ;;  %399 = vperm.xlu0 %2309, %v2632_v28  }
  0x4c   : > { %414 = vperm.xlu1 %2310, %v2637_v29   ;;  %409 = vperm.xlu0 %2309, %v2640_v30  }
  0x50   : > { %424 = vperm.xlu1 %2310, %v2645_v31   ;;  %419 = vperm.xlu0 %2309, %v231_v32  }
  0x54   : > { %434 = vperm.xlu1 %2310, %v234_v33   ;;  %429 = vperm.xlu0 %2309, %v2651_v34  }
  0x58   : > { %444 = vperm.xlu1 %2310, %v236_v35   ;;  %439 = vperm.xlu0 %2309, %v235_v36  }
  0x5c   : > { %454 = vperm.xlu1 %2310, %v238_v37   ;;  %449 = vperm.xlu0 %2309, %v237_v38  }
  0x60   : > { %2311 = vset.pattern.permute.xlu1 %v3410_v40  ;;  %459 = vperm.xlu0 %2309, %v239_v39  }
  0x61   : > { %727 = vperm.xlu1 %2311, %v2528_v2   ;;  %v2727_v2 = vld [vmem:[%s2522_s21 + $0x1d8] sm:$0xff] }
  0x64   : > { %464 = vperm.xlu0 %2309, %v240_v41  }
  0x65   : > { %731 = vperm.xlu1 %2311, %v2536_v4   ;;  %v2731_v4 = vld [vmem:[%s2522_s21 + $0x1e8] sm:$0xff] }
  0x68   : > { %474 = vperm.xlu0 %2309, %v2664_v42  }
  0x69   : > { %859 = vperm.xlu1 %2311, %v234_v33  }
  0x6c   : > { %484 = vperm.xlu0 %2309, %v2674_v46  }
  0x6d   : > { %863 = vperm.xlu1 %2311, %v235_v36  }
  0x70   : > { %494 = vperm.xlu0 %2309, %v2684_v50  }
  0x71   : > { %867 = vperm.xlu1 %2311, %v236_v35  }
  0x74   : > { %504 = vperm.xlu0 %2309, %v2694_v54  }
  0x75   : > { %871 = vperm.xlu1 %2311, %v237_v38  }
  0x78   : > { %514 = vperm.xlu0 %2309, %v2704_v58  }
  0x79   : > { %875 = vperm.xlu1 %2311, %v238_v37  }
  0x7c   : > { %524 = vperm.xlu0 %2309, %v2708_v59  }
  0x7d   : > { %751 = vperm.xlu1 %2311, %v2552_v8   ;;  %v2737_v8 = vld [vmem:[%s2522_s21 + $0x1f8] sm:$0xff] }
  0x80   : > { %534 = vperm.xlu0 %2309, %v2713_v60  }
  0x81   : > { %879 = vperm.xlu1 %2311, %v239_v39  }
  0x84   : > { %544 = vperm.xlu0 %2309, %v2717_v61  }
  0x85   : > { %883 = vperm.xlu1 %2311, %v240_v41  }
  0x88   : > { %554 = vperm.xlu0 %2309, %v2721_v62  }
  0x89   : > { %2312 = vset.pattern.permute.xlu1 %v3412_v0 }
  0x8a   : > { %469 = vperm.xlu1 %2312, %v241_v63  }
  0x8c   : > { %564 = vperm.xlu0 %2309, %v2727_v2  }
  0x8e   : > { %2313 = vset.pattern.permute.xlu1 %v3410_v40 }
  0x8f   : > { %759 = vperm.xlu1 %2313, %v2560_v10   ;;  %v243_v10 = vld [vmem:[%s2522_s21 + $0x150] sm:$0xff] }
  0x90   : > { %574 = vperm.xlu0 %2309, %v2731_v4  }
  0x93   : > { %v2739_v32 = vpop.permute.xlu1 %279  ;;  %887 = vperm.xlu1 %2313, %v241_v63   ;;  %v2741_v33 = vpop.permute.xlu0 %269 }
  0x94   : > { %584 = vperm.xlu0 %2309, %v2737_v8  }
  0x97   : > { %v2744_v35 = vpop.permute.xlu1 %284  ;;  %891 = vperm.xlu1 %2313, %v2664_v42   ;;  %v2747_v36 = vpop.permute.xlu0 %274 }
  0x98   : > { %2335 = vset.pattern.permute.xlu0 %v3410_v40 }
  0x99   : > { %855 = vperm.xlu0 %2335, %v2651_v34  }
  0x9b   : > { %v2752_v37 = vpop.permute.xlu1 %294  ;;  %2314 = vset.pattern.permute.xlu1 %v3412_v0  ;;  %v2755_v38 = vpop.permute.xlu0 %289 }
  0x9c   : > { %479 = vperm.xlu1 %2314, %v243_v10  }
  0x9d   : > { %735 = vperm.xlu0 %2335, %v2525_v1  }
  0x9f   : > { %v2758_v39 = vpop.permute.xlu1 %304  ;;  %v2760_v41 = vpop.permute.xlu0 %299 }
  0xa0   : > { %2315 = vset.pattern.permute.xlu1 %v3410_v40 }
  0xa1   : > { %767 = vperm.xlu1 %2315, %v2568_v12   ;;  %739 = vperm.xlu0 %2335, %v2533_v3   ;;  %v245_v3 = vld [vmem:[%s2522_s21 + $0x160] sm:$0xff] }
  0xa3   : > { %v2765_v34 = vpop.permute.xlu1 %314  ;;  %v2767_v42 = vpop.permute.xlu0 %309 }
  0xa5   : > { %895 = vperm.xlu1 %2315, %v243_v10   ;;  %743 = vperm.xlu0 %2335, %v2544_v6  }
  0xa7   : > { %v2770_v43 = vpop.permute.xlu1 %324  ;;  %v2772_v1 = vpop.permute.xlu0 %319 }
  0xa9   : > { %899 = vperm.xlu1 %2315, %v2674_v46   ;;  %747 = vperm.xlu0 %2335, %v2541_v5  }
  0xab   : > { %v2776_v44 = vpop.permute.xlu1 %334  ;;  %v2778_v12 = vpop.permute.xlu0 %329 }
  0xad   : > { %2316 = vset.pattern.permute.xlu1 %v3412_v0  ;;  %755 = vperm.xlu0 %2335, %v2549_v7  }
  0xae   : > { %489 = vperm.xlu1 %2316, %v245_v3  }
  0xaf   : > { %v2783_v45 = vpop.permute.xlu1 %344  ;;  %v2785_v6 = vpop.permute.xlu0 %339 }
  0xb1   : > { %763 = vperm.xlu0 %2335, %v2557_v9  }
  0xb2   : > { %2317 = vset.pattern.permute.xlu1 %v3410_v40 }
  0xb3   : > { %v2789_v5 = vpop.permute.xlu1 %354  ;;  %775 = vperm.xlu1 %2317, %v2576_v14   ;;  %v2792_v46 = vpop.permute.xlu0 %349  ;;  %v247_v14 = vld [vmem:[%s2522_s21 + $0x170] sm:$0xff] }
  0xb5   : > { %771 = vperm.xlu0 %2335, %v2565_v11  }
  0xb7   : > { %v2795_v47 = vpop.permute.xlu1 %364  ;;  %903 = vperm.xlu1 %2317, %v245_v3   ;;  %v2797_v7 = vpop.permute.xlu0 %359 }
  0xb9   : > { %779 = vperm.xlu0 %2335, %v2573_v13  }
  0xbb   : > { %v2800_v48 = vpop.permute.xlu1 %374  ;;  %907 = vperm.xlu1 %2317, %v2684_v50   ;;  %v2803_v9 = vpop.permute.xlu0 %369 }
  0xbc   : > { %3414 = vst [vmem:[#allocation2_spill] sm:$0xff] %v2800_v48  ;;  %3415 = vst [vmem:[#allocation3_spill] sm:$0xff] %v2803_v9 }
  0xbd   : > { %787 = vperm.xlu0 %2335, %v2581_v15  }
  0xbf   : > { %v2807_v49 = vpop.permute.xlu1 %384  ;;  %2318 = vset.pattern.permute.xlu1 %v3412_v0  ;;  %v2810_v11 = vpop.permute.xlu0 %379 }
  0xc0   : > { %3416 = vst [vmem:[#allocation4_spill] sm:$0xff] %v2807_v49  ;;  %3417 = vst [vmem:[#allocation5_spill] sm:$0xff] %v2810_v11  ;;  %499 = vperm.xlu1 %2318, %v247_v14   ;;  %v255_v11 = vld [vmem:[%s2522_s21 + $0x1b0] sm:$0xff] }
  0xc1   : > { %795 = vperm.xlu0 %2335, %v2589_v17  }
  0xc3   : > { %v2813_v13 = vpop.permute.xlu1 %394  ;;  %v2815_v51 = vpop.permute.xlu0 %389 }
  0xc4   : > { %3418 = vst [vmem:[#allocation6_spill] sm:$0xff] %v2813_v13  ;;  %3419 = vst [vmem:[#allocation7_spill] sm:$0xff] %v2815_v51  ;;  %2319 = vset.pattern.permute.xlu1 %v3410_v40 }
  0xc5   : > { %783 = vperm.xlu1 %2319, %v2584_v16   ;;  %803 = vperm.xlu0 %2335, %v2597_v19   ;;  %v249_v19 = vld [vmem:[%s2522_s21 + $0x180] sm:$0xff] }
  0xc7   : > { %v2820_v15 = vpop.permute.xlu1 %404  ;;  %v2822_v50 = vpop.permute.xlu0 %399 }
  0xc8   : > { %3420 = vst [vmem:[#allocation8_spill] sm:$0xff] %v2820_v15  ;;  %3421 = vst [vmem:[#allocation9_spill] sm:$0xff] %v2822_v50  ;;  %v253_v50 = vld [vmem:[%s2522_s21 + $0x1a0] sm:$0xff] }
  0xc9   : > { %911 = vperm.xlu1 %2319, %v247_v14   ;;  %811 = vperm.xlu0 %2335, %v2605_v21   ;;  %v251_v14 = vld [vmem:[%s2522_s21 + $0x190] sm:$0xff] }
  0xcb   : > { %v2825_v52 = vpop.permute.xlu1 %414  ;;  %v2827_v17 = vpop.permute.xlu0 %409 }
  0xcc   : > { %3422 = vst [vmem:[#allocation10_spill] sm:$0xff] %v2825_v52  ;;  %3423 = vst [vmem:[#allocation11_spill] sm:$0xff] %v2827_v17  ;;  %v3426_v17 = vmov 1  }
  0xcd   : > { %915 = vperm.xlu1 %2319, %v2694_v54   ;;  %819 = vperm.xlu0 %2335, %v2613_v23  }
  0xcf   : > { %v2831_v53 = vpop.permute.xlu1 %424  ;;  %v2833_v16 = vpop.permute.xlu0 %419 }
  0xd0   : > { %3424 = vst [vmem:[#allocation12_spill] sm:$0xff] %v2831_v53  ;;  %3425 = vst [vmem:[#allocation13_spill] sm:$0xff] %v2833_v16 }
  0xd1   : > { %2320 = vset.pattern.permute.xlu1 %v3412_v0  ;;  %827 = vperm.xlu0 %2335, %v2621_v25   ;;  %v2853_v25 = vld [vmem:[%s3406_s1] ss:$0 sm:$0xff] }
  0xd2   : > { %509 = vperm.xlu1 %2320, %v249_v19   ;;  %v591_v56 = vmul.f32 %v2853_v25, %v2741_v33  ;;  %v592_v33 = vmul.f32 %v2853_v25, %v2747_v36 }
  0xd3   : > { %v2838_v55 = vpop.permute.xlu1 %434  ;;  %v2840_v21 = vpop.permute.xlu0 %429 }
  0xd5   : > { %835 = vperm.xlu0 %2335, %v2629_v27  }
  0xd6   : > { %2321 = vset.pattern.permute.xlu1 %v3410_v40 }
  0xd7   : > { %v2844_v54 = vpop.permute.xlu1 %444  ;;  %791 = vperm.xlu1 %2321, %v2592_v18   ;;  %v2847_v23 = vpop.permute.xlu0 %439  ;;  %v2865_v18 = vld [vmem:[%s3407_s2] ss:$0 sm:$0xff] }
  0xd8   : > { %v661_v63 = vadd.f32 %v2865_v18, %v591_v56 }
  0xd9   : > { %843 = vperm.xlu0 %2335, %v2637_v29   ;;  %v2870_v29 = vld [vmem:[%s3406_s1 + $0x1] ss:$0 sm:$0xff] }
  0xdb   : > { %v2857_v27 = vpop.permute.xlu1 %454  ;;  %919 = vperm.xlu1 %2321, %v249_v19   ;;  %v2859_v57 = vpop.permute.xlu0 %449  ;;  %v662_v19 = vadd.f32 %v2865_v18, %v592_v33 }
  0xdd   : > { %851 = vperm.xlu0 %2335, %v2645_v31  }
  0xdf   : > { %923 = vperm.xlu1 %2321, %v2704_v58   ;;  %v2876_v10 = vpop.permute.xlu0 %459 }
  0xe0   : > { %v728_v31 = vpop.permute.xlu1 %727 }
  0xe1   : > { %v986_v3 = vmul.f32 %v2870_v29, %v728_v31 }
  0xe3   : > { %v1050_v40 = vadd.f32 %v986_v3, %v661_v63  ;;  %2322 = vset.pattern.permute.xlu1 %v3412_v0  ;;  %v2882_v16 = vpop.permute.xlu0 %464 }
  0xe4   : > { %519 = vperm.xlu1 %2322, %v251_v14   ;;  %v732_v56 = vpop.permute.xlu1 %731 }
  0xe5   : > { %2337 = vtanh.f32 %v1050_v40  ;;  %v987_v36 = vmul.f32 %v2870_v29, %v732_v56 }
  0xe7   : > { %v1051_v53 = vadd.f32 %v987_v36, %v662_v19  ;;  %v2885_v58 = vpop.permute.xlu0 %474 }
  0xe8   : > { %2323 = vset.pattern.permute.xlu1 %v3426_v17  ;;  %v860_v31 = vpop.permute.xlu1 %859 }
  0xe9   : > { %2339 = vtanh.f32 %v1051_v53  ;;  %799 = vperm.xlu1 %2323, %v2600_v20   ;;  %v3427_v20 = vmov 0  }
  0xeb   : > { %v2889_v63 = vpop.permute.xlu0 %484 }
  0xec   : > { %v864_v33 = vpop.permute.xlu1 %863 }
  0xed   : > { %927 = vperm.xlu1 %2323, %v251_v14  }
  0xef   : > { %v2338_v3 = vpop.eup %2337  ;;  %v2891_v0 = vpop.permute.xlu0 %494 }
  0xf0   : > { %v868_v40 = vpop.permute.xlu1 %867  ;;  %v1178_v52 = vmul.f32 %v2338_v3, %v2338_v3 }
  0xf1   : > { %931 = vperm.xlu1 %2323, %v2708_v59  }
  0xf2   : > { %v1242_v19 = vsub.f32 1.0, %v1178_v52 }
  0xf3   : > { %v2340_v56 = vpop.eup %2339  ;;  %v2894_v36 = vpop.permute.xlu0 %504 }
  0xf4   : > { %v1179_v53 = vmul.f32 %v2340_v56, %v2340_v56  ;;  %v872_v15 = vpop.permute.xlu1 %871  ;;  %2179 = vmatprep.mubr.msk.f32.mxu0 %vm1314_vm0, %v1242_v19 }
  0xf5   : > { %2324 = vset.pattern.permute.xlu1 %v3427_v20 }
  0xf6   : > { %529 = vperm.xlu1 %2324, %v253_v50   ;;  %v1243_v14 = vsub.f32 1.0, %v1179_v53 }
  0xf7   : > { %v2899_v51 = vpop.permute.xlu0 %514 }
  0xf8   : > { %v876_v3 = vpop.permute.xlu1 %875  ;;  %2180 = vmatmul.mubr.msk.f32.vlgmr.msra.gmra.mrb[0].mxu0 %vm1314_vm0, %v1243_v14 }
  0xfa   : > { %2325 = vset.pattern.permute.xlu1 %v3426_v17 }
  0xfb   : > { %807 = vperm.xlu1 %2325, %v2608_v22   ;;  %v2904_v59 = vpop.permute.xlu0 %524 }
  0xfc   : > { %3428 = vst [vmem:[#allocation14_spill] sm:$0xff] %v2904_v59  ;;  %v2906_v52 = vpop.permute.xlu1 %751  ;;  %v1020_v59 = vmul.f32 %v2870_v29, %v864_v33  ;;  %v630_v33 = vmul.f32 %v2853_v25, %v2882_v16 }
  0xff   : > { %935 = vperm.xlu1 %2325, %v253_v50   ;;  %v2908_v19 = vpop.permute.xlu0 %534 }
 0x100   : > { %3429 = vst [vmem:[#allocation15_spill] sm:$0xff] %v2908_v19  ;;  %v880_v56 = vpop.permute.xlu1 %879 }
 0x103   : > { %939 = vperm.xlu1 %2325, %v2713_v60   ;;  %v2911_v53 = vpop.permute.xlu0 %544  ;;  %v624_v60 = vmul.f32 %v2853_v25, %v2838_v55  ;;  %v627_v55 = vmul.f32 %v2853_v25, %v2859_v57  ;;  %v629_v57 = vmul.f32 %v2853_v25, %v2876_v10  ;;  %v597_v10 = vmul.f32 %v2853_v25, %v2760_v41 }
 0x104   : > { %3430 = vst [vmem:[#allocation16_spill] sm:$0xff] %v2911_v53  ;;  %v884_v13 = vpop.permute.xlu1 %883  ;;  %v625_v53 = vmul.f32 %v2853_v25, %v2847_v23  ;;  %v1024_v41 = vmul.f32 %v2870_v29, %v880_v56  ;;  %v595_v56 = vmul.f32 %v2853_v25, %v2755_v38  ;;  %v992_v38 = vmul.f32 %v2870_v29, %v2906_v52 }
 0x105   : > { %v694_v48 = vadd.f32 %v2865_v18, %v624_v60 }
 0x107   : > { %2326 = vset.pattern.permute.xlu1 %v3427_v20  ;;  %v2915_v14 = vpop.permute.xlu0 %554 }
 0x108   : > { %3431 = vst [vmem:[#allocation17_spill] sm:$0xff] %v2915_v14  ;;  %539 = vperm.xlu1 %2326, %v255_v11   ;;  %v1019_v14 = vmul.f32 %v2870_v29, %v860_v31 }
 0x109   : > { %v470_v22 = vpop.permute.xlu1 %469 }
 0x10a   : > { %v1083_v31 = vadd.f32 %v1019_v14, %v694_v48  ;;  %v257_v48 = vld [vmem:[%s2522_s21 + $0x1c0] sm:$0xff] }
 0x10b   : > { %v2917_v49 = vpop.permute.xlu0 %564 }
 0x10c   : > { %3432 = vst [vmem:[#allocation18_spill] sm:$0xff] %v2917_v49  ;;  %2327 = vset.pattern.permute.xlu1 %v3426_v17  ;;  %v626_v49 = vmul.f32 %v2853_v25, %v2844_v54  ;;  %2341 = vtanh.f32 %v1083_v31  ;;  %v632_v31 = vmul.f32 %v2853_v25, %v2885_v58  ;;  %v599_v58 = vmul.f32 %v2853_v25, %v2767_v42 }
 0x10d   : > { %815 = vperm.xlu1 %2327, %v2616_v24   ;;  %v695_v24 = vadd.f32 %v2865_v18, %v625_v53  ;;  %v628_v53 = vmul.f32 %v2853_v25, %v2857_v27 }
 0x10e   : > { %v2921_v50 = vpop.permute.xlu1 %759  ;;  %v696_v54 = vadd.f32 %v2865_v18, %v626_v49  ;;  %v594_v49 = vmul.f32 %v2853_v25, %v2744_v35  ;;  %v1023_v35 = vmul.f32 %v2870_v29, %v876_v3  ;;  %v669_v52 = vadd.f32 %v2865_v18, %v599_v58 }
 0x10f   : > { %v2927_v19 = vpop.permute.xlu0 %574 }
 0x110   : > { %3433 = vst [vmem:[#allocation19_spill] sm:$0xff] %v2927_v19  ;;  %v1021_v19 = vmul.f32 %v2870_v29, %v868_v40  ;;  %v697_v40 = vadd.f32 %v2865_v18, %v627_v55  ;;  %v664_v3 = vadd.f32 %v2865_v18, %v594_v49  ;;  %v702_v49 = vadd.f32 %v2865_v18, %v632_v31 }
 0x111   : > { %943 = vperm.xlu1 %2327, %v255_v11   ;;  %v623_v11 = vmul.f32 %v2853_v25, %v2840_v21  ;;  %v1022_v21 = vmul.f32 %v2870_v29, %v872_v15  ;;  %v698_v15 = vadd.f32 %v2865_v18, %v628_v53  ;;  %v631_v53 = vmul.f32 %v2853_v25, %v470_v22 }
 0x112   : > { %v888_v9 = vpop.permute.xlu1 %887  ;;  %v1085_v27 = vadd.f32 %v1021_v19, %v696_v54  ;;  %v1025_v54 = vmul.f32 %v2870_v29, %v884_v13 }
 0x113   : > { %v2937_v23 = vpop.permute.xlu0 %584  ;;  %v693_v16 = vadd.f32 %v2865_v18, %v623_v11  ;;  %v1086_v19 = vadd.f32 %v1022_v21, %v697_v40  ;;  %v667_v40 = vadd.f32 %v2865_v18, %v597_v10  ;;  %v1087_v21 = vadd.f32 %v1023_v35, %v698_v15 }
 0x114   : > { %3434 = vst [vmem:[#allocation20_spill] sm:$0xff] %v2937_v23  ;;  %v1084_v23 = vadd.f32 %v1020_v59, %v695_v24  ;;  %v699_v59 = vadd.f32 %v2865_v18, %v629_v57  ;;  %v1026_v22 = vmul.f32 %v2870_v29, %v888_v9  ;;  %v665_v15 = vadd.f32 %v2865_v18, %v595_v56 }
 0x115   : > { %947 = vperm.xlu1 %2327, %v2717_v61   ;;  %v593_v61 = vmul.f32 %v2853_v25, %v2739_v32  ;;  %v700_v32 = vadd.f32 %v2865_v18, %v630_v33 }
 0x116   : > { %v892_v60 = vpop.permute.xlu1 %891  ;;  %2343 = vtanh.f32 %v1084_v23  ;;  %v1088_v13 = vadd.f32 %v1024_v41, %v699_v59  ;;  %v2342_v59 = vpop.eup %2341  ;;  %v994_v41 = vmul.f32 %v2870_v29, %v2921_v50  ;;  %v601_v50 = vmul.f32 %v2853_v25, %v2772_v1 }
 0x117   : > { %2345 = vtanh.f32 %v1085_v27  ;;  %v663_v33 = vadd.f32 %v2865_v18, %v593_v61  ;;  %v1089_v27 = vadd.f32 %v1025_v54, %v700_v32 }
 0x118   : > { %v856_v14 = vpop.permute.xlu0 %855 }
 0x119   : > { %v1018_v55 = vmul.f32 %v2870_v29, %v856_v14  ;;  %2328 = vset.pattern.permute.xlu1 %v3427_v20  ;;  %v701_v14 = vadd.f32 %v2865_v18, %v631_v53 }
 0x11a   : > { %549 = vperm.xlu1 %2328, %v257_v48  }
 0x11b   : > { %v1082_v24 = vadd.f32 %v1018_v55, %v693_v16  ;;  %v480_v11 = vpop.permute.xlu1 %479  ;;  %v1027_v16 = vmul.f32 %v2870_v29, %v892_v60  ;;  %v1090_v32 = vadd.f32 %v1026_v22, %v701_v14  ;;  %v634_v60 = vmul.f32 %v2853_v25, %v2889_v63 }
 0x11c   : > { %v736_v57 = vpop.permute.xlu0 %735  ;;  %v633_v55 = vmul.f32 %v2853_v25, %v480_v11  ;;  %v598_v63 = vmul.f32 %v2853_v25, %v2758_v39 }
 0x11d   : > { %2347 = vtanh.f32 %v1082_v24  ;;  %v988_v23 = vmul.f32 %v2870_v29, %v736_v57  ;;  %v1091_v31 = vadd.f32 %v1027_v16, %v702_v49  ;;  %v704_v58 = vadd.f32 %v2865_v18, %v634_v60 }
 0x11e   : > { %2329 = vset.pattern.permute.xlu1 %v3426_v17  ;;  %2349 = vtanh.f32 %v1086_v19  ;;  %v1056_v19 = vadd.f32 %v992_v38, %v667_v40  ;;  %v703_v54 = vadd.f32 %v2865_v18, %v633_v55  ;;  %v1058_v49 = vadd.f32 %v994_v41, %v669_v52 }
 0x11f   : > { %v1052_v61 = vadd.f32 %v988_v23, %v663_v33  ;;  %823 = vperm.xlu1 %2329, %v2624_v26   ;;  %v596_v26 = vmul.f32 %v2853_v25, %v2752_v37  ;;  %v671_v41 = vadd.f32 %v2865_v18, %v601_v50 }
 0x120   : > { %v768_v10 = vpop.permute.xlu1 %767  ;;  %v740_v42 = vpop.permute.xlu0 %739 }
 0x121   : > { %2351 = vtanh.f32 %v1052_v61  ;;  %v989_v9 = vmul.f32 %v2870_v29, %v740_v42  ;;  %v2344_v11 = vpop.eup %2343  ;;  %v996_v55 = vmul.f32 %v2870_v29, %v768_v10  ;;  %v600_v10 = vmul.f32 %v2853_v25, %v2765_v34 }
 0x122   : > { %2353 = vtanh.f32 %v1087_v21  ;;  %v2346_v33 = vpop.eup %2345  ;;  %v1212_v21 = vmul.f32 %v2344_v11, %v2344_v11 }
 0x123   : > { %2355 = vtanh.f32 %v1088_v13  ;;  %v1053_v35 = vadd.f32 %v989_v9, %v664_v3  ;;  %951 = vperm.xlu1 %2329, %v257_v48   ;;  %v666_v48 = vadd.f32 %v2865_v18, %v596_v26  ;;  %v1211_v3 = vmul.f32 %v2342_v59, %v2342_v59 }
 0x124   : > { %2357 = vtanh.f32 %v1089_v27  ;;  %v896_v24 = vpop.permute.xlu1 %895  ;;  %v744_v37 = vpop.permute.xlu0 %743  ;;  %v3010_v27 = vld [vmem:[%s2522_s21 + $0x1d0] sm:$0xff]  ;;  %v1213_v14 = vmul.f32 %v2346_v33, %v2346_v33  ;;  %v668_v59 = vadd.f32 %v2865_v18, %v598_v63  ;;  %v1276_v60 = vsub.f32 1.0, %v1212_v21 }
 0x125   : > { %v1028_v53 = vmul.f32 %v2870_v29, %v896_v24  ;;  %v990_v57 = vmul.f32 %v2870_v29, %v744_v37  ;;  %2359 = vtanh.f32 %v1053_v35  ;;  %v1060_v34 = vadd.f32 %v996_v55, %v671_v41 }
 0x126   : > { %2361 = vtanh.f32 %v1090_v32  ;;  %v1277_v33 = vsub.f32 1.0, %v1213_v14 }
 0x127   : > { %v2348_v23 = vpop.eup %2347  ;;  %v1092_v56 = vadd.f32 %v1028_v53, %v703_v54  ;;  %v1054_v40 = vadd.f32 %v990_v57, %v665_v15  ;;  %955 = vperm.xlu1 %2329, %v2721_v62   ;;  %2363 = vtanh.f32 %v1056_v19  ;;  %v1275_v62 = vsub.f32 1.0, %v1211_v3 }
 0x128   : > { %v900_v13 = vpop.permute.xlu1 %899  ;;  %v748_v22 = vpop.permute.xlu0 %747  ;;  %v1210_v61 = vmul.f32 %v2348_v23, %v2348_v23  ;;  %2365 = vtanh.f32 %v1091_v31  ;;  %v602_v31 = vmul.f32 %v2853_v25, %v2770_v43  ;;  %v603_v54 = vmul.f32 %v2853_v25, %v2778_v12 }
 0x129   : > { %v2350_v39 = vpop.eup %2349  ;;  %v1029_v38 = vmul.f32 %v2870_v29, %v900_v13  ;;  %v991_v1 = vmul.f32 %v2870_v29, %v748_v22  ;;  %2367 = vtanh.f32 %v1054_v40  ;;  %v670_v12 = vadd.f32 %v2865_v18, %v600_v10 }
 0x12a   : > { %v1274_v42 = vsub.f32 1.0, %v1210_v61  ;;  %2369 = vtanh.f32 %v1092_v56  ;;  %v1214_v52 = vmul.f32 %v2350_v39, %v2350_v39  ;;  %v672_v21 = vadd.f32 %v2865_v18, %v602_v31 }
 0x12b   : > { %v2352_v16 = vpop.eup %2351  ;;  %v1093_v9 = vadd.f32 %v1029_v38, %v704_v58  ;;  %v1055_v26 = vadd.f32 %v991_v1, %v666_v48  ;;  %2330 = vset.pattern.permute.xlu1 %v3427_v20  ;;  %2371 = vtanh.f32 %v1058_v49  ;;  %v604_v13 = vmul.f32 %v2853_v25, %v2776_v44 }
 0x12c   : > { %v2354_v15 = vpop.eup %2353  ;;  %v1180_v32 = vmul.f32 %v2352_v16, %v2352_v16  ;;  %559 = vperm.xlu1 %2330, %v3010_v27   ;;  %2227 = vmatprep.mubr.msk.f32.mxu1 %vm1314_vm0, %v1274_v42  ;;  %v756_v35 = vpop.permute.xlu0 %755  ;;  %v1278_v43 = vsub.f32 1.0, %v1214_v52  ;;  %v673_v22 = vadd.f32 %v2865_v18, %v603_v54 }
 0x12d   : > { %v2356_v19 = vpop.eup %2355  ;;  %v993_v24 = vmul.f32 %v2870_v29, %v756_v35  ;;  %v490_v37 = vpop.permute.xlu1 %489  ;;  %2228 = vmatmul.mubr.msk.f32.vlgmr.msra.gmra.mrb[0].mxu1 %vm1314_vm0, %v1275_v62  ;;  %2373 = vtanh.f32 %v1055_v26  ;;  %v1215_v63 = vmul.f32 %v2354_v15, %v2354_v15  ;;  %v674_v52 = vadd.f32 %v2865_v18, %v604_v13 }
 0x12e   : > { %v2358_v11 = vpop.eup %2357  ;;  %v1244_v53 = vsub.f32 1.0, %v1180_v32  ;;  %2230 = vmatprep.mubr.msk.f32.mxu1 %vm1314_vm0, %v1276_v60  ;;  %2375 = vtanh.f32 %v1093_v9  ;;  %v1216_v3 = vmul.f32 %v2356_v19, %v2356_v19  ;;  %v635_v61 = vmul.f32 %v2853_v25, %v490_v37 }
 0x12f   : > { %v1057_v57 = vadd.f32 %v993_v24, %v668_v59  ;;  %v2360_v48 = vpop.eup %2359  ;;  %v1217_v42 = vmul.f32 %v2358_v11, %v2358_v11  ;;  %v1279_v55 = vsub.f32 1.0, %v1215_v63  ;;  %v636_v32 = vmul.f32 %v2853_v25, %v2891_v0 }
 0x130   : > { %2331 = vset.pattern.permute.xlu1 %v3426_v17  ;;  %2182 = vmatprep.mubr.msk.f32.mxu0 %vm1314_vm0, %v1244_v53  ;;  %v764_v23 = vpop.permute.xlu0 %763  ;;  %v2362_v50 = vpop.eup %2361  ;;  %v1181_v56 = vmul.f32 %v2360_v48, %v2360_v48  ;;  %v1280_v9 = vsub.f32 1.0, %v1216_v3  ;;  %v705_v60 = vadd.f32 %v2865_v18, %v635_v61  ;;  %v606_v63 = vmul.f32 %v2853_v25, %v2783_v45 }
 0x131   : > { %2377 = vtanh.f32 %v1057_v57  ;;  %v995_v40 = vmul.f32 %v2870_v29, %v764_v23  ;;  %831 = vperm.xlu1 %2331, %v2632_v28   ;;  %2231 = vmatmul.mubr.msk.f32.gmra.mrb[2].mxu1 %vm1314_vm0, %v1277_v33  ;;  %v2364_v58 = vpop.eup %2363  ;;  %v1218_v62 = vmul.f32 %v2362_v50, %v2362_v50  ;;  %v1281_v11 = vsub.f32 1.0, %v1217_v42 }
 0x132   : > { %v776_v39 = vpop.permute.xlu1 %775  ;;  %2233 = vmatprep.mubr.msk.f32.mxu1 %vm1314_vm0, %v1278_v43  ;;  %v2366_v49 = vpop.eup %2365  ;;  %2379 = vtanh.f32 %v1060_v34  ;;  %v1245_v38 = vsub.f32 1.0, %v1181_v56  ;;  %v1184_v35 = vmul.f32 %v2364_v58, %v2364_v58  ;;  %v706_v3 = vadd.f32 %v2865_v18, %v636_v32 }
 0x133   : > { %v1059_v1 = vadd.f32 %v995_v40, %v670_v12  ;;  %v998_v28 = vmul.f32 %v2870_v29, %v776_v39  ;;  %v2368_v14 = vpop.eup %2367  ;;  %v1282_v31 = vsub.f32 1.0, %v1218_v62  ;;  %v1219_v54 = vmul.f32 %v2366_v49, %v2366_v49 }
 0x134   : > { %v772_v16 = vpop.permute.xlu0 %771  ;;  %v2370_v44 = vpop.eup %2369  ;;  %v1182_v26 = vmul.f32 %v2368_v14, %v2368_v14  ;;  %2183 = vmatmul.mubr.msk.f32.gmra.mrb[2].mxu0 %vm1314_vm0, %v1245_v38  ;;  %v1248_v43 = vsub.f32 1.0, %v1184_v35  ;;  %v676_v14 = vadd.f32 %v2865_v18, %v606_v63 }
 0x135   : > { %2381 = vtanh.f32 %v1059_v1  ;;  %v1062_v15 = vadd.f32 %v998_v28, %v673_v22  ;;  %v997_v59 = vmul.f32 %v2870_v29, %v772_v16  ;;  %959 = vperm.xlu1 %2331, %v3010_v27   ;;  %2234 = vmatmul.mubr.msk.f32.gmra.mrb[4].mxu1 %vm1314_vm0, %v1279_v55  ;;  %v2372_v10 = vpop.eup %2371  ;;  %v1220_v53 = vmul.f32 %v2370_v44, %v2370_v44  ;;  %v261_v22 = vld [vmem:[%s2522_s21 + $0x1e0] sm:$0xff] }
 0x136   : > { %v904_v19 = vpop.permute.xlu1 %903  ;;  %v1246_v41 = vsub.f32 1.0, %v1182_v26  ;;  %2236 = vmatprep.mubr.msk.f32.mxu1 %vm1314_vm0, %v1280_v9  ;;  %v1186_v58 = vmul.f32 %v2372_v10, %v2372_v10  ;;  %v605_v26 = vmul.f32 %v2853_v25, %v2785_v6 }
 0x137   : > { %2383 = vtanh.f32 %v1062_v15  ;;  %v1061_v24 = vadd.f32 %v997_v59, %v672_v21  ;;  %v1030_v37 = vmul.f32 %v2870_v29, %v904_v19  ;;  %v2374_v27 = vpop.eup %2373  ;;  %v1284_v39 = vsub.f32 1.0, %v1220_v53 }
 0x138   : > { %v780_v0 = vpop.permute.xlu0 %779  ;;  %v2376_v34 = vpop.eup %2375  ;;  %v1183_v57 = vmul.f32 %v2374_v27, %v2374_v27  ;;  %2185 = vmatprep.mubr.msk.f32.mxu0 %vm1314_vm0, %v1246_v41  ;;  %v1250_v62 = vsub.f32 1.0, %v1186_v58  ;;  %v675_v6 = vadd.f32 %v2865_v18, %v605_v26  ;;  %v263_v58 = vld [vmem:[%s2522_s21 + $0x1f0] sm:$0xff]  ;;  %v640_v26 = vmul.f32 %v2853_v25, %v2899_v51 }
 0x139   : > { %2385 = vtanh.f32 %v1061_v24  ;;  %v1094_v33 = vadd.f32 %v1030_v37, %v705_v60  ;;  %v999_v48 = vmul.f32 %v2870_v29, %v780_v0  ;;  %963 = vperm.xlu1 %2331, %v2727_v2   ;;  %2237 = vmatmul.mubr.msk.f32.gmra.mrb[6].mxu1 %vm1314_vm0, %v1281_v11  ;;  %v1283_v2 = vsub.f32 1.0, %v1219_v54 }
 0x13a   : > { %v908_v23 = vpop.permute.xlu1 %907  ;;  %v1247_v12 = vsub.f32 1.0, %v1183_v57  ;;  %2239 = vmatprep.mubr.msk.f32.mxu1 %vm1314_vm0, %v1282_v31  ;;  %v1221_v21 = vmul.f32 %v2376_v34, %v2376_v34  ;;  %v638_v57 = vmul.f32 %v2853_v25, %v2894_v36  ;;  %v610_v51 = vmul.f32 %v2853_v25, %v2795_v47 }
 0x13b   : > { %v2378_v50 = vpop.eup %2377  ;;  %2387 = vtanh.f32 %v1094_v33  ;;  %v1063_v56 = vadd.f32 %v999_v48, %v674_v52  ;;  %v1031_v40 = vmul.f32 %v2870_v29, %v908_v23 }
 0x13c   : > { %v1185_v13 = vmul.f32 %v2378_v50, %v2378_v50  ;;  %v788_v45 = vpop.permute.xlu0 %787  ;;  %v2380_v61 = vpop.eup %2379  ;;  %2186 = vmatmul.mubr.msk.f32.gmra.mrb[4].mxu0 %vm1314_vm0, %v1247_v12  ;;  %v1285_v55 = vsub.f32 1.0, %v1221_v21  ;;  %v708_v36 = vadd.f32 %v2865_v18, %v638_v57 }
 0x13d   : > { %2389 = vtanh.f32 %v1063_v56  ;;  %v1095_v49 = vadd.f32 %v1031_v40, %v706_v3  ;;  %2332 = vset.pattern.permute.xlu1 %v3427_v20  ;;  %v1001_v1 = vmul.f32 %v2870_v29, %v788_v45  ;;  %2188 = vmatprep.mubr.msk.f32.mxu0 %vm1314_vm0, %v1248_v43  ;;  %v1188_v16 = vmul.f32 %v2380_v61, %v2380_v61 }
 0x13e   : > { %v1249_v38 = vsub.f32 1.0, %v1185_v13  ;;  %2240 = vmatmul.mubr.msk.f32.gmra.mrb[8].mxu1 %vm1314_vm0, %v1283_v2  ;;  %569 = vperm.xlu1 %2332, %v261_v22   ;;  %v608_v40 = vmul.f32 %v2853_v25, %v2789_v5  ;;  %v607_v61 = vmul.f32 %v2853_v25, %v2792_v46 }
 0x13f   : > { %v2382_v28 = vpop.eup %2381  ;;  %2391 = vtanh.f32 %v1095_v49  ;;  %2242 = vmatprep.mubr.msk.f32.mxu1 %vm1314_vm0, %v1284_v39  ;;  %v500_v42 = vpop.permute.xlu1 %499  ;;  %v1065_v59 = vadd.f32 %v1001_v1, %v676_v14  ;;  %v1252_v32 = vsub.f32 1.0, %v1188_v16  ;;  %v2465_v1 = vld [vmem:[%s2522_s21 + $0xf0] sm:$0xff] }
 0x140   : > { %v1187_v9 = vmul.f32 %v2382_v28, %v2382_v28  ;;  %2189 = vmatmul.mubr.msk.f32.gmra.mrb[6].mxu0 %vm1314_vm0, %v1249_v38  ;;  %v637_v41 = vmul.f32 %v2853_v25, %v500_v42  ;;  %v796_v12 = vpop.permute.xlu0 %795  ;;  %v678_v45 = vadd.f32 %v2865_v18, %v608_v40 }
 0x141   : > { %v2384_v44 = vpop.eup %2383  ;;  %2191 = vmatprep.mubr.msk.f32.mxu0 %vm1314_vm0, %v1250_v62  ;;  %2393 = vtanh.f32 %v1065_v59 }
 0x142   : > { %v1251_v15 = vsub.f32 1.0, %v1187_v9  ;;  %2243 = vmatmul.mubr.msk.f32.gmra.mrb[10].mxu1 %vm1314_vm0, %v1285_v55  ;;  %2333 = vset.pattern.permute.xlu1 %v3426_v17  ;;  %v1190_v35 = vmul.f32 %v2384_v44, %v2384_v44  ;;  %v707_v33 = vadd.f32 %v2865_v18, %v637_v41 }
 0x143   : > { %v2386_v52 = vpop.eup %2385  ;;  %839 = vperm.xlu1 %2333, %v2640_v30  }
 0x144   : > { %v1189_v60 = vmul.f32 %v2386_v52, %v2386_v52  ;;  %v784_v19 = vpop.permute.xlu1 %783  ;;  %2192 = vmatmul.mubr.msk.f32.gmra.mrb[8].mxu0 %vm1314_vm0, %v1251_v15  ;;  %v1254_v54 = vsub.f32 1.0, %v1190_v35 }
 0x145   : > { %v2388_v10 = vpop.eup %2387  ;;  %v1000_v24 = vmul.f32 %v2870_v29, %v784_v19  ;;  %2194 = vmatprep.mubr.msk.f32.mxu0 %vm1314_vm0, %v1252_v32  ;;  %v710_v19 = vadd.f32 %v2865_v18, %v640_v26 }
 0x146   : > { %v1253_v37 = vsub.f32 1.0, %v1189_v60  ;;  %v1222_v27 = vmul.f32 %v2388_v10, %v2388_v10  ;;  %v804_v10 = vpop.permute.xlu0 %803 }
 0x147   : > { %v2390_v11 = vpop.eup %2389  ;;  %v1064_v31 = vadd.f32 %v1000_v24, %v675_v6  ;;  %967 = vperm.xlu1 %2333, %v261_v22  }
 0x148   : > { %v1286_v53 = vsub.f32 1.0, %v1222_v27  ;;  %v1191_v30 = vmul.f32 %v2390_v11, %v2390_v11  ;;  %v912_v0 = vpop.permute.xlu1 %911  ;;  %2195 = vmatmul.mubr.msk.f32.gmra.mrb[10].mxu0 %vm1314_vm0, %v1253_v37  ;;  %v1005_v37 = vmul.f32 %v2870_v29, %v804_v10  ;;  %v3438_v10 = vld [vmem:[#allocation15_spill] sm:$0xff] }
 0x149   : > { %v2392_v34 = vpop.eup %2391  ;;  %2395 = vtanh.f32 %v1064_v31  ;;  %v1032_v48 = vmul.f32 %v2870_v29, %v912_v0  ;;  %2197 = vmatprep.mubr.msk.f32.mxu0 %vm1314_vm0, %v1254_v54  ;;  %v609_v31 = vmul.f32 %v2853_v25, %v2797_v7 }
 0x14a   : > { %v1255_v63 = vsub.f32 1.0, %v1191_v30  ;;  %v1223_v3 = vmul.f32 %v2392_v34, %v2392_v34  ;;  %2245 = vmatprep.mubr.msk.f32.mxu1 %vm1314_vm0, %v1286_v53 }
 0x14b   : > { %v1096_v23 = vadd.f32 %v1032_v48, %v707_v33  ;;  %971 = vperm.xlu1 %2333, %v2731_v4   ;;  %v2394_v21 = vpop.eup %2393  ;;  %v1003_v4 = vmul.f32 %v2870_v29, %v796_v12  ;;  %v679_v57 = vadd.f32 %v2865_v18, %v609_v31 }
 0x14c   : > { %v1287_v43 = vsub.f32 1.0, %v1223_v3  ;;  %v916_v50 = vpop.permute.xlu1 %915  ;;  %2198 = vmatmul.mubr.msk.f32.gmra.mrb[12].mxu0 %vm1314_vm0, %v1255_v63  ;;  %v1193_v5 = vmul.f32 %v2394_v21, %v2394_v21 }
 0x14d   : > { %2397 = vtanh.f32 %v1096_v23  ;;  %v1033_v56 = vmul.f32 %v2870_v29, %v916_v50  ;;  %v1067_v39 = vadd.f32 %v1003_v4, %v678_v45  ;;  %v812_v45 = vpop.permute.xlu0 %811 }
 0x14e   : > { %2246 = vmatmul.mubr.msk.f32.gmra.mrb[12].mxu1 %vm1314_vm0, %v1287_v43  ;;  %v1257_v42 = vsub.f32 1.0, %v1193_v5 }
 0x14f   : > { %v1097_v2 = vadd.f32 %v1033_v56, %v708_v36  ;;  %2334 = vset.pattern.permute.xlu1 %v3427_v20  ;;  %v677_v20 = vadd.f32 %v2865_v18, %v607_v61  ;;  %v3435_v36 = vld [vmem:[#allocation14_spill] sm:$0xff] }
 0x150   : > { %579 = vperm.xlu1 %2334, %v263_v58   ;;  %v642_v12 = vmul.f32 %v2853_v25, %v3435_v36  ;;  %v3436_v61 = vld [vmem:[#allocation2_spill] sm:$0xff] }
 0x151   : > { %2399 = vtanh.f32 %v1097_v2  ;;  %v510_v13 = vpop.permute.xlu1 %509  ;;  %v612_v5 = vmul.f32 %v2853_v25, %v3436_v61  ;;  %v820_v31 = vpop.permute.xlu0 %819 }
 0x152   : > { %v639_v62 = vmul.f32 %v2853_v25, %v510_v13  ;;  %2401 = vtanh.f32 %v1067_v39  ;;  %v712_v13 = vadd.f32 %v2865_v18, %v642_v12 }
 0x153   : > { %v2396_v22 = vpop.eup %2395 }
 0x154   : > { %v1192_v49 = vmul.f32 %v2396_v22, %v2396_v22  ;;  %2336 = vset.pattern.permute.xlu1 %v3426_v17  ;;  %v709_v15 = vadd.f32 %v2865_v18, %v639_v62 }
 0x155   : > { %847 = vperm.xlu1 %2336, %v2465_v1  }
 0x156   : > { %v1256_v38 = vsub.f32 1.0, %v1192_v49  ;;  %v792_v28 = vpop.permute.xlu1 %791 }
 0x157   : > { %v2398_v14 = vpop.eup %2397  ;;  %v1002_v16 = vmul.f32 %v2870_v29, %v792_v28  ;;  %v682_v28 = vadd.f32 %v2865_v18, %v612_v5  ;;  %v3179_v5 = vld [vmem:[%s3407_s2] ss:$0 sm:$0xff] }
 0x158   : > { %v1224_v55 = vmul.f32 %v2398_v14, %v2398_v14  ;;  %2200 = vmatprep.mubr.msk.f32.mxu0 %vm1314_vm0, %v1256_v38  ;;  %v1007_v38 = vmul.f32 %v2870_v29, %v812_v45 }
 0x159   : > { %v1066_v46 = vadd.f32 %v1002_v16, %v677_v20  ;;  %2201 = vmatmul.mubr.msk.f32.gmra.mrb[14].mxu0 %vm1314_vm0, %v1257_v42  ;;  %975 = vperm.xlu1 %2336, %v263_v58   ;;  %v3437_v20 = vld [vmem:[#allocation3_spill] sm:$0xff] }
 0x15a   : > { %v1288_v17 = vsub.f32 1.0, %v1224_v55  ;;  %v920_v9 = vpop.permute.xlu1 %919  ;;  %v611_v42 = vmul.f32 %v2853_v25, %v3437_v20  ;;  %v1071_v16 = vadd.f32 %v1007_v38, %v682_v28 }
 0x15b   : > { %v2400_v44 = vpop.eup %2399  ;;  %2403 = vtanh.f32 %v1066_v46  ;;  %v1034_v59 = vmul.f32 %v2870_v29, %v920_v9 }
 0x15c   : > { %v1225_v52 = vmul.f32 %v2400_v44, %v2400_v44  ;;  %2248 = vmatprep.mubr.msk.f32.mxu1 %vm1314_vm0, %v1288_v17  ;;  %v2402_v24 = vpop.eup %2401  ;;  %v681_v44 = vadd.f32 %v2865_v18, %v611_v42  ;;  %v828_v42 = vpop.permute.xlu0 %827 }
 0x15d   : > { %v1098_v32 = vadd.f32 %v1034_v59, %v709_v15  ;;  %979 = vperm.xlu1 %2336, %v2737_v8   ;;  %v680_v8 = vadd.f32 %v2865_v18, %v610_v51  ;;  %v1195_v54 = vmul.f32 %v2402_v24, %v2402_v24 }
 0x15e   : > { %v1289_v35 = vsub.f32 1.0, %v1225_v52  ;;  %v924_v60 = vpop.permute.xlu1 %923 }
 0x15f   : > { %2405 = vtanh.f32 %v1098_v32  ;;  %v1035_v6 = vmul.f32 %v2870_v29, %v924_v60  ;;  %v1069_v53 = vadd.f32 %v1005_v37, %v680_v8  ;;  %v1259_v33 = vsub.f32 1.0, %v1195_v54 }
 0x160   : > { %2249 = vmatmul.mubr.msk.f32.gmra.mrb[14].mxu1 %vm1314_vm0, %v1289_v35 }
 0x161   : > { %v1099_v41 = vadd.f32 %v1035_v6, %v710_v19  ;;  %v644_v6 = vmul.f32 %v2853_v25, %v3438_v10 }
 0x163   : > { %2407 = vtanh.f32 %v1099_v41  ;;  %v520_v27 = vpop.permute.xlu1 %519 }
 0x164   : > { %v641_v48 = vmul.f32 %v2853_v25, %v520_v27  ;;  %2409 = vtanh.f32 %v1069_v53  ;;  %v3439_v53 = vld [vmem:[#allocation4_spill] sm:$0xff] }
 0x165   : > { %v2404_v11 = vpop.eup %2403 }
 0x166   : > { %v1194_v30 = vmul.f32 %v2404_v11, %v2404_v11  ;;  %v711_v56 = vadd.f32 %v2865_v18, %v641_v48  ;;  %v714_v11 = vadd.f32 %v2865_v18, %v644_v6 }
 0x168   : > { %v1258_v0 = vsub.f32 1.0, %v1194_v30  ;;  %v800_v34 = vpop.permute.xlu1 %799  ;;  %v614_v30 = vmul.f32 %v2853_v25, %v3439_v53  ;;  %v3444_v53 = vld [vmem:[#allocation17_spill] sm:$0xff] }
 0x169   : > { %v2406_v47 = vpop.eup %2405  ;;  %v1004_v63 = vmul.f32 %v2870_v29, %v800_v34 }
 0x16a   : > { %v1226_v3 = vmul.f32 %v2406_v47, %v2406_v47  ;;  %2203 = vmatprep.mubr.msk.f32.mxu0 %vm1314_vm0, %v1258_v0  ;;  %v1009_v47 = vmul.f32 %v2870_v29, %v820_v31 }
 0x16b   : > { %v1068_v23 = vadd.f32 %v1004_v63, %v679_v57  ;;  %2204 = vmatmul.mubr.msk.f32.gmra.mrb[16].mxu0 %vm1314_vm0, %v1259_v33  ;;  %v684_v33 = vadd.f32 %v2865_v18, %v614_v30  ;;  %v3440_v63 = vld [vmem:[#allocation5_spill] sm:$0xff] }
 0x16c   : > { %v1290_v7 = vsub.f32 1.0, %v1226_v3  ;;  %v928_v43 = vpop.permute.xlu1 %927  ;;  %v613_v3 = vmul.f32 %v2853_v25, %v3440_v63 }
 0x16d   : > { %v2408_v50 = vpop.eup %2407  ;;  %2411 = vtanh.f32 %v1068_v23  ;;  %v1036_v40 = vmul.f32 %v2870_v29, %v928_v43 }
 0x16e   : > { %v1227_v58 = vmul.f32 %v2408_v50, %v2408_v50  ;;  %2251 = vmatprep.mubr.msk.f32.mxu1 %vm1314_vm0, %v1290_v7  ;;  %v2410_v49 = vpop.eup %2409  ;;  %v1073_v7 = vadd.f32 %v1009_v47, %v684_v33 }
 0x16f   : > { %v1100_v2 = vadd.f32 %v1036_v40, %v711_v56  ;;  %v1197_v62 = vmul.f32 %v2410_v49, %v2410_v49  ;;  %v683_v56 = vadd.f32 %v2865_v18, %v613_v3  ;;  %v836_v3 = vpop.permute.xlu0 %835 }
 0x170   : > { %v1291_v21 = vsub.f32 1.0, %v1227_v58  ;;  %v932_v4 = vpop.permute.xlu1 %931 }
 0x171   : > { %2413 = vtanh.f32 %v1100_v2  ;;  %v1037_v22 = vmul.f32 %v2870_v29, %v932_v4  ;;  %v1261_v26 = vsub.f32 1.0, %v1197_v62 }
 0x172   : > { %2252 = vmatmul.mubr.msk.f32.gmra.mrb[16].mxu1 %vm1314_vm0, %v1291_v21 }
 0x173   : > { %v1101_v39 = vadd.f32 %v1037_v22, %v712_v13  ;;  %v3441_v22 = vld [vmem:[#allocation16_spill] sm:$0xff] }
 0x175   : > { %2415 = vtanh.f32 %v1101_v39  ;;  %v530_v1 = vpop.permute.xlu1 %529 }
 0x176   : > { %v643_v15 = vmul.f32 %v2853_v25, %v530_v1  ;;  %2417 = vtanh.f32 %v1071_v16  ;;  %v3169_v25 = vld [vmem:[%s3406_s1 + $0x1] ss:$0 sm:$0xff] }
 0x177   : > { %v2412_v14 = vpop.eup %2411  ;;  %v3442_v16 = vld [vmem:[#allocation6_spill] sm:$0xff] }
 0x178   : > { %v1196_v55 = vmul.f32 %v2412_v14, %v2412_v14  ;;  %v713_v51 = vadd.f32 %v2865_v18, %v643_v15 }
 0x17a   : > { %v1260_v46 = vsub.f32 1.0, %v1196_v55  ;;  %v808_v17 = vpop.permute.xlu1 %807 }
 0x17b   : > { %v2414_v9 = vpop.eup %2413  ;;  %v1006_v59 = vmul.f32 %v2870_v29, %v808_v17 }
 0x17c   : > { %v1228_v52 = vmul.f32 %v2414_v9, %v2414_v9  ;;  %2206 = vmatprep.mubr.msk.f32.mxu0 %vm1314_vm0, %v1260_v46  ;;  %v1011_v9 = vmul.f32 %v3169_v25, %v828_v42 }
 0x17d   : > { %v1070_v32 = vadd.f32 %v1006_v59, %v681_v44  ;;  %2207 = vmatmul.mubr.msk.f32.gmra.mrb[18].mxu0 %vm1314_vm0, %v1261_v26  ;;  %v3443_v59 = vld [vmem:[#allocation7_spill] sm:$0xff] }
 0x17e   : > { %v1292_v35 = vsub.f32 1.0, %v1228_v52  ;;  %v936_v60 = vpop.permute.xlu1 %935 }
 0x17f   : > { %v2416_v19 = vpop.eup %2415  ;;  %2419 = vtanh.f32 %v1070_v32  ;;  %v1038_v41 = vmul.f32 %v2870_v29, %v936_v60 }
 0x180   : > { %v1229_v24 = vmul.f32 %v2416_v19, %v2416_v19  ;;  %2254 = vmatprep.mubr.msk.f32.mxu1 %vm1314_vm0, %v1292_v35  ;;  %v2418_v34 = vpop.eup %2417 }
 0x181   : > { %v1102_v37 = vadd.f32 %v1038_v41, %v713_v51  ;;  %v1199_v23 = vmul.f32 %v2418_v34, %v2418_v34 }
 0x182   : > { %v1293_v27 = vsub.f32 1.0, %v1229_v24  ;;  %v940_v8 = vpop.permute.xlu1 %939 }
 0x183   : > { %2421 = vtanh.f32 %v1102_v37  ;;  %v1039_v54 = vmul.f32 %v2870_v29, %v940_v8  ;;  %v1263_v40 = vsub.f32 1.0, %v1199_v23  ;;  %v3163_v29 = vld [vmem:[%s3406_s1] ss:$0 sm:$0xff] }
 0x184   : > { %2255 = vmatmul.mubr.msk.f32.gmra.mrb[18].mxu1 %vm1314_vm0, %v1293_v27  ;;  %v646_v61 = vmul.f32 %v3163_v29, %v3441_v22  ;;  %v616_v55 = vmul.f32 %v3163_v29, %v3442_v16  ;;  %v615_v52 = vmul.f32 %v3163_v29, %v3443_v59  ;;  %v648_v30 = vmul.f32 %v3163_v29, %v3444_v53  ;;  %v3447_v16 = vld [vmem:[#allocation18_spill] sm:$0xff] }
 0x185   : > { %v1103_v0 = vadd.f32 %v1039_v54, %v714_v11 }
 0x186   : > { %v716_v20 = vadd.f32 %v3179_v5, %v646_v61  ;;  %v686_v26 = vadd.f32 %v3179_v5, %v616_v55  ;;  %v685_v51 = vadd.f32 %v3179_v5, %v615_v52  ;;  %v718_v63 = vadd.f32 %v3179_v5, %v648_v30 }
 0x187   : > { %2423 = vtanh.f32 %v1103_v0  ;;  %v540_v57 = vpop.permute.xlu1 %539  ;;  %v650_v55 = vmul.f32 %v3163_v29, %v3447_v16 }
 0x188   : > { %v645_v58 = vmul.f32 %v3163_v29, %v540_v57  ;;  %2425 = vtanh.f32 %v1073_v7  ;;  %v1075_v35 = vadd.f32 %v1011_v9, %v686_v26  ;;  %v3445_v7 = vld [vmem:[#allocation8_spill] sm:$0xff] }
 0x189   : > { %v2420_v48 = vpop.eup %2419  ;;  %v720_v59 = vadd.f32 %v3179_v5, %v650_v55 }
 0x18a   : > { %v1198_v43 = vmul.f32 %v2420_v48, %v2420_v48  ;;  %v715_v39 = vadd.f32 %v3179_v5, %v645_v58 }
 0x18c   : > { %v1262_v50 = vsub.f32 1.0, %v1198_v43  ;;  %v816_v36 = vpop.permute.xlu1 %815  ;;  %v618_v43 = vmul.f32 %v3163_v29, %v3445_v7 }
 0x18d   : > { %v2422_v12 = vpop.eup %2421  ;;  %v1008_v2 = vmul.f32 %v3169_v25, %v816_v36 }
 0x18e   : > { %v1230_v21 = vmul.f32 %v2422_v12, %v2422_v12  ;;  %2209 = vmatprep.mubr.msk.f32.mxu0 %vm1314_vm0, %v1262_v50  ;;  %v1013_v12 = vmul.f32 %v3169_v25, %v836_v3 }
 0x18f   : > { %v1072_v18 = vadd.f32 %v1008_v2, %v683_v56  ;;  %2210 = vmatmul.mubr.msk.f32.gmra.mrb[20].mxu0 %vm1314_vm0, %v1263_v40  ;;  %v688_v40 = vadd.f32 %v3179_v5, %v618_v43  ;;  %v3446_v2 = vld [vmem:[#allocation9_spill] sm:$0xff] }
 0x190   : > { %v1294_v4 = vsub.f32 1.0, %v1230_v21  ;;  %v944_v13 = vpop.permute.xlu1 %943  ;;  %v617_v21 = vmul.f32 %v3163_v29, %v3446_v2 }
 0x191   : > { %v2424_v45 = vpop.eup %2423  ;;  %2427 = vtanh.f32 %v1072_v18  ;;  %v1040_v49 = vmul.f32 %v3169_v25, %v944_v13 }
 0x192   : > { %v1231_v38 = vmul.f32 %v2424_v45, %v2424_v45  ;;  %2257 = vmatprep.mubr.msk.f32.mxu1 %vm1314_vm0, %v1294_v4  ;;  %v2426_v17 = vpop.eup %2425  ;;  %v1077_v4 = vadd.f32 %v1013_v12, %v688_v40 }
 0x193   : > { %v1104_v1 = vadd.f32 %v1040_v49, %v715_v39  ;;  %v1201_v32 = vmul.f32 %v2426_v17, %v2426_v17  ;;  %v687_v39 = vadd.f32 %v3179_v5, %v617_v21 }
 0x194   : > { %v1295_v28 = vsub.f32 1.0, %v1231_v38  ;;  %v948_v14 = vpop.permute.xlu1 %947 }
 0x195   : > { %2429 = vtanh.f32 %v1104_v1  ;;  %v1041_v62 = vmul.f32 %v3169_v25, %v948_v14  ;;  %v1265_v41 = vsub.f32 1.0, %v1201_v32  ;;  %v844_v32 = vpop.permute.xlu0 %843 }
 0x196   : > { %2258 = vmatmul.mubr.msk.f32.gmra.mrb[20].mxu1 %vm1314_vm0, %v1295_v28 }
 0x197   : > { %v1105_v46 = vadd.f32 %v1041_v62, %v716_v20 }
 0x199   : > { %2431 = vtanh.f32 %v1105_v46  ;;  %v550_v44 = vpop.permute.xlu1 %549 }
 0x19a   : > { %v647_v24 = vmul.f32 %v3163_v29, %v550_v44  ;;  %2433 = vtanh.f32 %v1075_v35  ;;  %v3448_v35 = vld [vmem:[#allocation10_spill] sm:$0xff] }
 0x19b   : > { %v2428_v15 = vpop.eup %2427 }
 0x19c   : > { %v1200_v60 = vmul.f32 %v2428_v15, %v2428_v15  ;;  %v717_v0 = vadd.f32 %v3179_v5, %v647_v24 }
 0x19e   : > { %v1264_v19 = vsub.f32 1.0, %v1200_v60  ;;  %v824_v10 = vpop.permute.xlu1 %823  ;;  %v620_v60 = vmul.f32 %v3163_v29, %v3448_v35 }
 0x19f   : > { %v2430_v6 = vpop.eup %2429  ;;  %v1010_v37 = vmul.f32 %v3169_v25, %v824_v10 }
 0x1a0   : > { %v1232_v27 = vmul.f32 %v2430_v6, %v2430_v6  ;;  %2212 = vmatprep.mubr.msk.f32.mxu0 %vm1314_vm0, %v1264_v19  ;;  %v1015_v6 = vmul.f32 %v3169_v25, %v844_v32  ;;  %v690_v24 = vadd.f32 %v3179_v5, %v620_v60 }
 0x1a1   : > { %v1074_v8 = vadd.f32 %v1010_v37, %v685_v51  ;;  %2213 = vmatmul.mubr.msk.f32.gmra.mrb[22].mxu0 %vm1314_vm0, %v1265_v41 }
 0x1a2   : > { %v1296_v11 = vsub.f32 1.0, %v1232_v27  ;;  %v952_v31 = vpop.permute.xlu1 %951  ;;  %v3449_v27 = vld [vmem:[#allocation11_spill] sm:$0xff] }
 0x1a3   : > { %v2432_v54 = vpop.eup %2431  ;;  %2435 = vtanh.f32 %v1074_v8  ;;  %v1042_v34 = vmul.f32 %v3169_v25, %v952_v31  ;;  %v619_v8 = vmul.f32 %v3163_v29, %v3449_v27  ;;  %v1079_v31 = vadd.f32 %v1015_v6, %v690_v24 }
 0x1a4   : > { %v1233_v47 = vmul.f32 %v2432_v54, %v2432_v54  ;;  %2260 = vmatprep.mubr.msk.f32.mxu1 %vm1314_vm0, %v1296_v11  ;;  %v2434_v36 = vpop.eup %2433 }
 0x1a5   : > { %v1106_v57 = vadd.f32 %v1042_v34, %v717_v0  ;;  %v1203_v18 = vmul.f32 %v2434_v36, %v2434_v36  ;;  %v689_v34 = vadd.f32 %v3179_v5, %v619_v8 }
 0x1a6   : > { %v1297_v33 = vsub.f32 1.0, %v1233_v47  ;;  %v956_v48 = vpop.permute.xlu1 %955 }
 0x1a7   : > { %2437 = vtanh.f32 %v1106_v57  ;;  %v1043_v23 = vmul.f32 %v3169_v25, %v956_v48  ;;  %v1267_v49 = vsub.f32 1.0, %v1203_v18  ;;  %v852_v18 = vpop.permute.xlu0 %851 }
 0x1a8   : > { %2261 = vmatmul.mubr.msk.f32.gmra.mrb[22].mxu1 %vm1314_vm0, %v1297_v33 }
 0x1a9   : > { %v1107_v50 = vadd.f32 %v1043_v23, %v718_v63  ;;  %v3450_v23 = vld [vmem:[#allocation19_spill] sm:$0xff] }
 0x1aa   : > { %v652_v7 = vmul.f32 %v3163_v29, %v3450_v23 }
 0x1ab   : > { %2439 = vtanh.f32 %v1107_v50  ;;  %v560_v56 = vpop.permute.xlu1 %559 }
 0x1ac   : > { %v649_v38 = vmul.f32 %v3163_v29, %v560_v56  ;;  %2441 = vtanh.f32 %v1077_v4  ;;  %v722_v21 = vadd.f32 %v3179_v5, %v652_v7 }
 0x1ad   : > { %v2436_v58 = vpop.eup %2435 }
 0x1ae   : > { %v1202_v13 = vmul.f32 %v2436_v58, %v2436_v58  ;;  %v719_v46 = vadd.f32 %v3179_v5, %v649_v38 }
 0x1b0   : > { %v1266_v45 = vsub.f32 1.0, %v1202_v13  ;;  %v832_v22 = vpop.permute.xlu1 %831 }
 0x1b1   : > { %v2438_v61 = vpop.eup %2437  ;;  %v1012_v1 = vmul.f32 %v3169_v25, %v832_v22 }
 0x1b2   : > { %v1234_v28 = vmul.f32 %v2438_v61, %v2438_v61  ;;  %2215 = vmatprep.mubr.msk.f32.mxu0 %vm1314_vm0, %v1266_v45  ;;  %v3451_v45 = vld [vmem:[#allocation12_spill] sm:$0xff] }
 0x1b3   : > { %v1076_v14 = vadd.f32 %v1012_v1, %v687_v39  ;;  %2216 = vmatmul.mubr.msk.f32.gmra.mrb[24].mxu0 %vm1314_vm0, %v1267_v49  ;;  %v622_v22 = vmul.f32 %v3163_v29, %v3451_v45  ;;  %v1017_v49 = vmul.f32 %v3169_v25, %v852_v18 }
 0x1b4   : > { %v1298_v20 = vsub.f32 1.0, %v1234_v28  ;;  %v960_v42 = vpop.permute.xlu1 %959 }
 0x1b5   : > { %v2440_v62 = vpop.eup %2439  ;;  %2443 = vtanh.f32 %v1076_v14  ;;  %v1044_v17 = vmul.f32 %v3169_v25, %v960_v42  ;;  %v692_v1 = vadd.f32 %v3179_v5, %v622_v22  ;;  %v3452_v14 = vld [vmem:[#allocation13_spill] sm:$0xff] }
 0x1b6   : > { %v1235_v9 = vmul.f32 %v2440_v62, %v2440_v62  ;;  %2263 = vmatprep.mubr.msk.f32.mxu1 %vm1314_vm0, %v1298_v20  ;;  %v2442_v10 = vpop.eup %2441  ;;  %v621_v20 = vmul.f32 %v3163_v29, %v3452_v14 }
 0x1b7   : > { %v1108_v44 = vadd.f32 %v1044_v17, %v719_v46  ;;  %v1205_v37 = vmul.f32 %v2442_v10, %v2442_v10  ;;  %v1081_v62 = vadd.f32 %v1017_v49, %v692_v1 }
 0x1b8   : > { %v1299_v26 = vsub.f32 1.0, %v1235_v9  ;;  %v964_v15 = vpop.permute.xlu1 %963  ;;  %v691_v9 = vadd.f32 %v3179_v5, %v621_v20 }
 0x1b9   : > { %2445 = vtanh.f32 %v1108_v44  ;;  %v1045_v52 = vmul.f32 %v3169_v25, %v964_v15  ;;  %v1269_v30 = vsub.f32 1.0, %v1205_v37 }
 0x1ba   : > { %2264 = vmatmul.mubr.msk.f32.gmra.mrb[24].mxu1 %vm1314_vm0, %v1299_v26 }
 0x1bb   : > { %v1109_v19 = vadd.f32 %v1045_v52, %v720_v59 }
 0x1bd   : > { %2447 = vtanh.f32 %v1109_v19  ;;  %v570_v51 = vpop.permute.xlu1 %569  ;;  %v3453_v19 = vld [vmem:[#allocation20_spill] sm:$0xff] }
 0x1be   : > { %v651_v57 = vmul.f32 %v3163_v29, %v570_v51  ;;  %2449 = vtanh.f32 %v1079_v31  ;;  %v654_v10 = vmul.f32 %v3163_v29, %v3453_v19 }
 0x1bf   : > { %v2444_v41 = vpop.eup %2443 }
 0x1c0   : > { %v1204_v11 = vmul.f32 %v2444_v41, %v2444_v41  ;;  %v721_v36 = vadd.f32 %v3179_v5, %v651_v57  ;;  %v724_v8 = vadd.f32 %v3179_v5, %v654_v10 }
 0x1c2   : > { %v1268_v54 = vsub.f32 1.0, %v1204_v11  ;;  %v840_v0 = vpop.permute.xlu1 %839 }
 0x1c3   : > { %v2446_v53 = vpop.eup %2445  ;;  %v1014_v33 = vmul.f32 %v3169_v25, %v840_v0 }
 0x1c4   : > { %v1236_v47 = vmul.f32 %v2446_v53, %v2446_v53  ;;  %2218 = vmatprep.mubr.msk.f32.mxu0 %vm1314_vm0, %v1268_v54 }
 0x1c5   : > { %2219 = vmatmul.mubr.msk.f32.gmra.mrb[26].mxu0 %vm1314_vm0, %v1269_v30  ;;  %v1078_v63 = vadd.f32 %v1014_v33, %v689_v34 }
 0x1c6   : > { %v1300_v48 = vsub.f32 1.0, %v1236_v47  ;;  %v968_v43 = vpop.permute.xlu1 %967 }
 0x1c7   : > { %v2448_v3 = vpop.eup %2447  ;;  %2451 = vtanh.f32 %v1078_v63  ;;  %v1046_v12 = vmul.f32 %v3169_v25, %v968_v43 }
 0x1c8   : > { %v1237_v50 = vmul.f32 %v2448_v3, %v2448_v3  ;;  %2266 = vmatprep.mubr.msk.f32.mxu1 %vm1314_vm0, %v1300_v48  ;;  %v2450_v39 = vpop.eup %2449 }
 0x1c9   : > { %v1110_v40 = vadd.f32 %v1046_v12, %v721_v36  ;;  %v1207_v42 = vmul.f32 %v2450_v39, %v2450_v39 }
 0x1ca   : > { %v1301_v56 = vsub.f32 1.0, %v1237_v50  ;;  %v972_v58 = vpop.permute.xlu1 %971 }
 0x1cb   : > { %v2181_v2 = vpop.f32.mrb[0].mxu0  ;;  %2453 = vtanh.f32 %v1110_v40  ;;  %v1047_v4 = vmul.f32 %v3169_v25, %v972_v58  ;;  %v1271_v44 = vsub.f32 1.0, %v1207_v42 }
 0x1cc   : > { %1894 = vst.msk [vmem:[%s3246_s29 + $0x8] sm:$0xff] %vm1892_vm1, %v2181_v2  ;;  %v1573_v13 = vpop.f32.mrb[1].mxu0  ;;  %2267 = vmatmul.mubr.msk.f32.gmra.mrb[26].mxu1 %vm1314_vm0, %v1301_v56 }
 0x1cd   : > { %1893 = vst.msk [vmem:[%s3246_s29] sm:$0xff] %vm1892_vm1, %v1573_v13  ;;  %v1111_v61 = vadd.f32 %v1047_v4, %v722_v21 }
 0x1cf   : > { %2455 = vtanh.f32 %v1111_v61  ;;  %v580_v38 = vpop.permute.xlu1 %579 }
 0x1d0   : > { %v653_v26 = vmul.f32 %v3163_v29, %v580_v38  ;;  %2457 = vtanh.f32 %v1081_v62 }
 0x1d1   : > { %v2452_v28 = vpop.eup %2451 }
 0x1d2   : > { %v1206_v16 = vmul.f32 %v2452_v28, %v2452_v28  ;;  %v723_v6 = vadd.f32 %v3179_v5, %v653_v26 }
 0x1d4   : > { %v1270_v55 = vsub.f32 1.0, %v1206_v16  ;;  %v848_v46 = vpop.permute.xlu1 %847 }
 0x1d5   : > { %v2454_v17 = vpop.eup %2453  ;;  %v1016_v15 = vmul.f32 %v3169_v25, %v848_v46 }
 0x1d6   : > { %v1238_v59 = vmul.f32 %v2454_v17, %v2454_v17  ;;  %2221 = vmatprep.mubr.msk.f32.mxu0 %vm1314_vm0, %v1270_v55 }
 0x1d7   : > { %v1080_v52 = vadd.f32 %v1016_v15, %v691_v9  ;;  %2222 = vmatmul.mubr.msk.f32.gmra.mrb[28].mxu0 %vm1314_vm0, %v1271_v44 }
 0x1d8   : > { %v1302_v32 = vsub.f32 1.0, %v1238_v59  ;;  %v976_v35 = vpop.permute.xlu1 %975 }
 0x1d9   : > { %v2456_v60 = vpop.eup %2455  ;;  %2459 = vtanh.f32 %v1080_v52  ;;  %v1048_v51 = vmul.f32 %v3169_v25, %v976_v35 }
 0x1da   : > { %v1239_v41 = vmul.f32 %v2456_v60, %v2456_v60  ;;  %2269 = vmatprep.mubr.msk.f32.mxu1 %vm1314_vm0, %v1302_v32  ;;  %v2458_v29 = vpop.eup %2457 }
 0x1db   : > { %v1112_v24 = vadd.f32 %v1048_v51, %v723_v6  ;;  %v1209_v53 = vmul.f32 %v2458_v29, %v2458_v29 }
 0x1dc   : > { %v1303_v37 = vsub.f32 1.0, %v1239_v41  ;;  %v980_v27 = vpop.permute.xlu1 %979 }
 0x1dd   : > { %2461 = vtanh.f32 %v1112_v24  ;;  %v1049_v11 = vmul.f32 %v3169_v25, %v980_v27  ;;  %v1273_v47 = vsub.f32 1.0, %v1209_v53 }
 0x1de   : > { %2270 = vmatmul.mubr.msk.f32.gmra.mrb[28].mxu1 %vm1314_vm0, %v1303_v37 }
 0x1df   : > { %v1113_v31 = vadd.f32 %v1049_v11, %v724_v8 }
 0x1e1   : > { %2463 = vtanh.f32 %v1113_v31 }
 0x1e3   : > { %v2460_v54 = vpop.eup %2459 }
 0x1e4   : > { %v1208_v30 = vmul.f32 %v2460_v54, %v2460_v54 }
 0x1e6   : > { %v1272_v0 = vsub.f32 1.0, %v1208_v30 }
 0x1e7   : > { %v2462_v34 = vpop.eup %2461 }
 0x1e8   : > { %v1240_v57 = vmul.f32 %v2462_v34, %v2462_v34  ;;  %2224 = vmatprep.mubr.msk.f32.mxu0 %vm1314_vm0, %v1272_v0 }
 0x1e9   : > { %2225 = vmatmul.mubr.msk.f32.gmra.mrb[30].mxu0 %vm1314_vm0, %v1273_v47 }
 0x1ea   : > { %v1304_v25 = vsub.f32 1.0, %v1240_v57 }
 0x1eb   : > { %v2464_v5 = vpop.eup %2463 }
 0x1ec   : > { %v1241_v33 = vmul.f32 %v2464_v5, %v2464_v5  ;;  %2272 = vmatprep.mubr.msk.f32.mxu1 %vm1314_vm0, %v1304_v25 }
 0x1ee   : > { %v1305_v48 = vsub.f32 1.0, %v1241_v33 }
 0x1f0   : > { %2273 = vmatmul.mubr.msk.f32.gmra.mrb[30].mxu1 %vm1314_vm0, %v1305_v48 }
 0x200   : > { %v2229_v63 = vpop.f32.mrb[0].mxu1 }
 0x201   : > { %1926 = vst.msk [vmem:[%s3246_s29 + $0x108] sm:$0xff] %vm1892_vm1, %v2229_v63  ;;  %v1733_v3 = vpop.f32.mrb[1].mxu1 }
 0x202   : > { %1925 = vst.msk [vmem:[%s3246_s29 + $0x100] sm:$0xff] %vm1892_vm1, %v1733_v3 }
 0x204   : > { %v2232_v23 = vpop.f32.mrb[2].mxu1 }
 0x205   : > { %1928 = vst.msk [vmem:[%s3246_s29 + $0x118] sm:$0xff] %vm1892_vm1, %v2232_v23  ;;  %v1743_v7 = vpop.f32.mrb[3].mxu1 }
 0x206   : > { %1927 = vst.msk [vmem:[%s3246_s29 + $0x110] sm:$0xff] %vm1892_vm1, %v1743_v7 }
 0x207   : > { %v2184_v43 = vpop.f32.mrb[2].mxu0 }
 0x208   : > { %1896 = vst.msk [vmem:[%s3246_s29 + $0x18] sm:$0xff] %vm1892_vm1, %v2184_v43  ;;  %v1583_v50 = vpop.f32.mrb[3].mxu0  ;;  %v2235_v36 = vpop.f32.mrb[4].mxu1 }
 0x209   : > { %1895 = vst.msk [vmem:[%s3246_s29 + $0x10] sm:$0xff] %vm1892_vm1, %v1583_v50  ;;  %1930 = vst.msk [vmem:[%s3246_s29 + $0x128] sm:$0xff] %vm1892_vm1, %v2235_v36  ;;  %v1753_v12 = vpop.f32.mrb[5].mxu1 }
 0x20a   : > { %1929 = vst.msk [vmem:[%s3246_s29 + $0x120] sm:$0xff] %vm1892_vm1, %v1753_v12 }
 0x20c   : > { %v2238_v56 = vpop.f32.mrb[6].mxu1 }
 0x20d   : > { %1932 = vst.msk [vmem:[%s3246_s29 + $0x138] sm:$0xff] %vm1892_vm1, %v2238_v56  ;;  %v1763_v40 = vpop.f32.mrb[7].mxu1 }
 0x20e   : > { %1931 = vst.msk [vmem:[%s3246_s29 + $0x130] sm:$0xff] %vm1892_vm1, %v1763_v40 }
 0x20f   : > { %v2187_v58 = vpop.f32.mrb[4].mxu0 }
 0x210   : > { %1898 = vst.msk [vmem:[%s3246_s29 + $0x28] sm:$0xff] %vm1892_vm1, %v2187_v58  ;;  %v1593_v2 = vpop.f32.mrb[5].mxu0 }
 0x211   : > { %v2241_v21 = vpop.f32.mrb[8].mxu1  ;;  %1897 = vst.msk [vmem:[%s3246_s29 + $0x20] sm:$0xff] %vm1892_vm1, %v1593_v2 }
 0x212   : > { %1934 = vst.msk [vmem:[%s3246_s29 + $0x148] sm:$0xff] %vm1892_vm1, %v2241_v21  ;;  %v1773_v18 = vpop.f32.mrb[9].mxu1 }
 0x213   : > { %1933 = vst.msk [vmem:[%s3246_s29 + $0x140] sm:$0xff] %vm1892_vm1, %v1773_v18  ;;  %v2190_v4 = vpop.f32.mrb[6].mxu0 }
 0x214   : > { %1900 = vst.msk [vmem:[%s3246_s29 + $0x38] sm:$0xff] %vm1892_vm1, %v2190_v4  ;;  %v1603_v13 = vpop.f32.mrb[7].mxu0 }
 0x215   : > { %v2244_v45 = vpop.f32.mrb[10].mxu1  ;;  %1899 = vst.msk [vmem:[%s3246_s29 + $0x30] sm:$0xff] %vm1892_vm1, %v1603_v13 }
 0x216   : > { %1936 = vst.msk [vmem:[%s3246_s29 + $0x158] sm:$0xff] %vm1892_vm1, %v2244_v45  ;;  %v1783_v22 = vpop.f32.mrb[11].mxu1 }
 0x217   : > { %1935 = vst.msk [vmem:[%s3246_s29 + $0x150] sm:$0xff] %vm1892_vm1, %v1783_v22  ;;  %v2193_v61 = vpop.f32.mrb[8].mxu0 }
 0x218   : > { %1902 = vst.msk [vmem:[%s3246_s29 + $0x48] sm:$0xff] %vm1892_vm1, %v2193_v61  ;;  %v1613_v39 = vpop.f32.mrb[9].mxu0 }
 0x219   : > { %1901 = vst.msk [vmem:[%s3246_s29 + $0x40] sm:$0xff] %vm1892_vm1, %v1613_v39 }
 0x21b   : > { %v2196_v49 = vpop.f32.mrb[10].mxu0 }
 0x21c   : > { %1904 = vst.msk [vmem:[%s3246_s29 + $0x58] sm:$0xff] %vm1892_vm1, %v2196_v49  ;;  %v1623_v38 = vpop.f32.mrb[11].mxu0 }
 0x21d   : > { %1903 = vst.msk [vmem:[%s3246_s29 + $0x50] sm:$0xff] %vm1892_vm1, %v1623_v38 }
 0x21f   : > { %v2199_v1 = vpop.f32.mrb[12].mxu0 }
 0x220   : > { %1906 = vst.msk [vmem:[%s3246_s29 + $0x68] sm:$0xff] %vm1892_vm1, %v2199_v1  ;;  %v1633_v28 = vpop.f32.mrb[13].mxu0 }
 0x221   : > { %v2247_v14 = vpop.f32.mrb[12].mxu1  ;;  %1905 = vst.msk [vmem:[%s3246_s29 + $0x60] sm:$0xff] %vm1892_vm1, %v1633_v28 }
 0x222   : > { %1938 = vst.msk [vmem:[%s3246_s29 + $0x168] sm:$0xff] %vm1892_vm1, %v2247_v14  ;;  %v1793_v20 = vpop.f32.mrb[13].mxu1 }
 0x223   : > { %1937 = vst.msk [vmem:[%s3246_s29 + $0x160] sm:$0xff] %vm1892_vm1, %v1793_v20 }
 0x22c   : > { %v2202_v42 = vpop.f32.mrb[14].mxu0 }
 0x22d   : > { %1908 = vst.msk [vmem:[%s3246_s29 + $0x78] sm:$0xff] %vm1892_vm1, %v2202_v42  ;;  %v1643_v62 = vpop.f32.mrb[15].mxu0 }
 0x22e   : > { %1907 = vst.msk [vmem:[%s3246_s29 + $0x70] sm:$0xff] %vm1892_vm1, %v1643_v62 }
 0x233   : > { %v2250_v16 = vpop.f32.mrb[14].mxu1 }
 0x234   : > { %1940 = vst.msk [vmem:[%s3246_s29 + $0x178] sm:$0xff] %vm1892_vm1, %v2250_v16  ;;  %v1803_v55 = vpop.f32.mrb[15].mxu1 }
 0x235   : > { %1939 = vst.msk [vmem:[%s3246_s29 + $0x170] sm:$0xff] %vm1892_vm1, %v1803_v55 }
 0x23e   : > { %v2205_v46 = vpop.f32.mrb[16].mxu0 }
 0x23f   : > { %1910 = vst.msk [vmem:[%s3246_s29 + $0x88] sm:$0xff] %vm1892_vm1, %v2205_v46  ;;  %v1653_v17 = vpop.f32.mrb[17].mxu0 }
 0x240   : > { %1909 = vst.msk [vmem:[%s3246_s29 + $0x80] sm:$0xff] %vm1892_vm1, %v1653_v17 }
 0x245   : > { %v2253_v9 = vpop.f32.mrb[16].mxu1 }
 0x246   : > { %1942 = vst.msk [vmem:[%s3246_s29 + $0x188] sm:$0xff] %vm1892_vm1, %v2253_v9  ;;  %v1813_v44 = vpop.f32.mrb[17].mxu1 }
 0x247   : > { %1941 = vst.msk [vmem:[%s3246_s29 + $0x180] sm:$0xff] %vm1892_vm1, %v1813_v44 }
 0x250   : > { %v2208_v26 = vpop.f32.mrb[18].mxu0 }
 0x251   : > { %1912 = vst.msk [vmem:[%s3246_s29 + $0x98] sm:$0xff] %vm1892_vm1, %v2208_v26  ;;  %v1663_v15 = vpop.f32.mrb[19].mxu0 }
 0x252   : > { %1911 = vst.msk [vmem:[%s3246_s29 + $0x90] sm:$0xff] %vm1892_vm1, %v1663_v15 }
 0x257   : > { %v2256_v59 = vpop.f32.mrb[18].mxu1 }
 0x258   : > { %1944 = vst.msk [vmem:[%s3246_s29 + $0x198] sm:$0xff] %vm1892_vm1, %v2256_v59  ;;  %v1823_v52 = vpop.f32.mrb[19].mxu1 }
 0x259   : > { %1943 = vst.msk [vmem:[%s3246_s29 + $0x190] sm:$0xff] %vm1892_vm1, %v1823_v52 }
 0x262   : > { %v2211_v32 = vpop.f32.mrb[20].mxu0 }
 0x263   : > { %1914 = vst.msk [vmem:[%s3246_s29 + $0xa8] sm:$0xff] %vm1892_vm1, %v2211_v32  ;;  %v1673_v35 = vpop.f32.mrb[21].mxu0 }
 0x264   : > { %1913 = vst.msk [vmem:[%s3246_s29 + $0xa0] sm:$0xff] %vm1892_vm1, %v1673_v35 }
 0x269   : > { %v2259_v60 = vpop.f32.mrb[20].mxu1 }
 0x26a   : > { %1946 = vst.msk [vmem:[%s3246_s29 + $0x1a8] sm:$0xff] %vm1892_vm1, %v2259_v60  ;;  %v1833_v19 = vpop.f32.mrb[21].mxu1 }
 0x26b   : > { %1945 = vst.msk [vmem:[%s3246_s29 + $0x1a0] sm:$0xff] %vm1892_vm1, %v1833_v19 }
 0x274   : > { %v2214_v10 = vpop.f32.mrb[22].mxu0 }
 0x275   : > { %1916 = vst.msk [vmem:[%s3246_s29 + $0xb8] sm:$0xff] %vm1892_vm1, %v2214_v10  ;;  %v1683_v6 = vpop.f32.mrb[23].mxu0 }
 0x276   : > { %1915 = vst.msk [vmem:[%s3246_s29 + $0xb0] sm:$0xff] %vm1892_vm1, %v1683_v6 }
 0x27b   : > { %v2262_v51 = vpop.f32.mrb[22].mxu1 }
 0x27c   : > { %1948 = vst.msk [vmem:[%s3246_s29 + $0x1b8] sm:$0xff] %vm1892_vm1, %v2262_v51  ;;  %v1843_v41 = vpop.f32.mrb[23].mxu1 }
 0x27d   : > { %1947 = vst.msk [vmem:[%s3246_s29 + $0x1b0] sm:$0xff] %vm1892_vm1, %v1843_v41 }
 0x286   : > { %v2217_v24 = vpop.f32.mrb[24].mxu0 }
 0x287   : > { %1918 = vst.msk [vmem:[%s3246_s29 + $0xc8] sm:$0xff] %vm1892_vm1, %v2217_v24  ;;  %v1693_v37 = vpop.f32.mrb[25].mxu0 }
 0x288   : > { %1917 = vst.msk [vmem:[%s3246_s29 + $0xc0] sm:$0xff] %vm1892_vm1, %v1693_v37 }
 0x28d   : > { %v2265_v27 = vpop.f32.mrb[24].mxu1 }
 0x28e   : > { %1950 = vst.msk [vmem:[%s3246_s29 + $0x1c8] sm:$0xff] %vm1892_vm1, %v2265_v27  ;;  %v1853_v8 = vpop.f32.mrb[25].mxu1 }
 0x28f   : > { %1949 = vst.msk [vmem:[%s3246_s29 + $0x1c0] sm:$0xff] %vm1892_vm1, %v1853_v8 }
 0x298   : > { %v2220_v11 = vpop.f32.mrb[26].mxu0 }
 0x299   : > { %1920 = vst.msk [vmem:[%s3246_s29 + $0xd8] sm:$0xff] %vm1892_vm1, %v2220_v11  ;;  %v1703_v31 = vpop.f32.mrb[27].mxu0 }
 0x29a   : > { %1919 = vst.msk [vmem:[%s3246_s29 + $0xd0] sm:$0xff] %vm1892_vm1, %v1703_v31 }
 0x29f   : > { %v2268_v29 = vpop.f32.mrb[26].mxu1 }
 0x2a0   : > { %1952 = vst.msk [vmem:[%s3246_s29 + $0x1d8] sm:$0xff] %vm1892_vm1, %v2268_v29  ;;  %v1863_v54 = vpop.f32.mrb[27].mxu1 }
 0x2a1   : > { %1951 = vst.msk [vmem:[%s3246_s29 + $0x1d0] sm:$0xff] %vm1892_vm1, %v1863_v54 }
 0x2aa   : > { %v2223_v53 = vpop.f32.mrb[28].mxu0 }
 0x2ab   : > { %1922 = vst.msk [vmem:[%s3246_s29 + $0xe8] sm:$0xff] %vm1892_vm1, %v2223_v53  ;;  %v1713_v30 = vpop.f32.mrb[29].mxu0 }
 0x2ac   : > { %1921 = vst.msk [vmem:[%s3246_s29 + $0xe0] sm:$0xff] %vm1892_vm1, %v1713_v30 }
 0x2b1   : > { %v2271_v0 = vpop.f32.mrb[28].mxu1 }
 0x2b2   : > { %1954 = vst.msk [vmem:[%s3246_s29 + $0x1e8] sm:$0xff] %vm1892_vm1, %v2271_v0  ;;  %v1873_v34 = vpop.f32.mrb[29].mxu1 }
 0x2b3   : > { %1953 = vst.msk [vmem:[%s3246_s29 + $0x1e0] sm:$0xff] %vm1892_vm1, %v1873_v34 }
 0x2bc   : > { %v2226_v47 = vpop.f32.mrb[30].mxu0 }
 0x2bd   : > { %1924 = vst.msk [vmem:[%s3246_s29 + $0xf8] sm:$0xff] %vm1892_vm1, %v2226_v47  ;;  %v1723_v57 = vpop.f32.mrb[31].mxu0 }
 0x2be   : > { %1923 = vst.msk [vmem:[%s3246_s29 + $0xf0] sm:$0xff] %vm1892_vm1, %v1723_v57 }
 0x2c3   : > { %v2274_v25 = vpop.f32.mrb[30].mxu1 }
 0x2c4   : > { %1956 = vst.msk [vmem:[%s3246_s29 + $0x1f8] sm:$0xff] %vm1892_vm1, %v2274_v25  ;;  %v1883_v5 = vpop.f32.mrb[31].mxu1 }
 0x2c5   : > { %1955 = vst.msk [vmem:[%s3246_s29 + $0x1f0] sm:$0xff] %vm1892_vm1, %v1883_v5 }
 0x2c6 PF: > { %s14_s15 = sadd.s32 1, %s2475_s15  }
 0x2c7   : > { %p11_p4 = scmp.ge.s32.totalorder %s14_s15, 6  }
 0x2c9   :  { %13 = sbr.rel (!%p11_p4) target bundleno = 1 (0x1), region = 66 }

</bundles_post_ra>
